<compile_context>
chip_gen: v7x
topology: tpu7x:2x2x1
jax: 0.10.0
libtpu: 0.0.40
codegen_flags: <defaults>
</compile_context>

<pallas_src>
import functools

import jax
import jax.numpy as jnp
from jax.experimental import pallas as pl
from jax.experimental.pallas import tpu as pltpu

_LANE = 128
_SUBLANE = 8


def _round_up(n, m):
    return ((n + m - 1) // m) * m


def _pad2(a, rows, cols):
    return jnp.pad(a, ((0, rows - a.shape[0]), (0, cols - a.shape[1])))


# -----------------------------------------------------------------------------
# One-time parameter preparation (hoisted out of the per-RHS-eval forward).
# -----------------------------------------------------------------------------
def prepare_ode_params(weights, biases):
    """Pads & packs the MLP parameters into lane-dense, VMEM-resident slabs.

    weights: list of [in_i, out_i] float32 arrays (transposed vs. torch [out, in])
    biases:  list of [1, out_i] float32 arrays
    Returns a tuple of arrays: (w_in, b_slab, wh, w_out, b_out).
      w_in   [P_in,  P_hid]
      b_slab [L+1, 1, P_hid]   (input-layer bias + hidden-layer biases)
      wh     [max(L,1), P_hid, P_hid]   (dummy zeros slab when L == 0, never read)
      w_out  [P_hid, P_out]
      b_out  [1,     P_out]
    Zero padding is exact because tanh(0) = 0 and padded bias lanes are 0.
    """
    num_linear = len(weights)
    assert num_linear >= 2, "expect at least input and output Linear layers"
    num_hidden = num_linear - 2

    in_dim = weights[0].shape[0]
    hid_dim = weights[0].shape[1]
    out_dim = weights[-1].shape[1]

    p_in = _round_up(in_dim, _LANE)
    p_hid = _round_up(hid_dim, _LANE)
    p_out = _round_up(out_dim, _LANE)

    w_in = _pad2(jnp.asarray(weights[0], jnp.float32), p_in, p_hid)
    w_out = _pad2(jnp.asarray(weights[-1], jnp.float32), p_hid, p_out)
    b_out = _pad2(jnp.asarray(biases[-1], jnp.float32), 1, p_out)

    # Input-layer bias + all hidden-layer biases share width P_hid -> one slab.
    b_slab = jnp.stack(
        [_pad2(jnp.asarray(b, jnp.float32), 1, p_hid) for b in biases[:-1]]
    )  # [L+1, 1, P_hid]

    if num_hidden > 0:
        wh = jnp.stack(
            [_pad2(jnp.asarray(w, jnp.float32), p_hid, p_hid)
             for w in weights[1:-1]]
        )  # [L, P_hid, P_hid]
    else:
        # Dummy slab (kernel loop range is 0, never read).
        wh = jnp.zeros((1, p_hid, p_hid), jnp.float32)

    return (w_in, b_slab, wh, w_out, b_out)


# -----------------------------------------------------------------------------
# Kernel
# -----------------------------------------------------------------------------
def _make_ode_kernel(num_hidden: int, tanh_reg: bool, bf16_act: bool,
                     mxu_highest: bool):
    mm_prec = jax.lax.Precision.HIGHEST if mxu_highest else None

    def _mm(h, w):
        return jnp.dot(h, w, preferred_element_type=jnp.float32,
                       precision=mm_prec)

    def _act(h):
        if bf16_act:
            # bf16 EUP path (v6e/v7x): ~2x transcendental throughput.
            return jnp.tanh(h.astype(jnp.bfloat16)).astype(jnp.float32)
        return jnp.tanh(h)

    def kernel(reg_ref,                              # SMEM prefetch: [reg, 1/reg]
               x_ref, w_in_ref, b_slab_ref, wh_ref, w_out_ref, b_out_ref,
               out_ref):
        h = x_ref[...]                                           # [TB, P_in]
        h = _act(_mm(h, w_in_ref[...]) + b_slab_ref[0])          # input layer
        for l in range(num_hidden):                              # static unroll
            h = _act(_mm(h, wh_ref[l]) + b_slab_ref[l + 1])      # hidden layer
        h = _mm(h, w_out_ref[...]) + b_out_ref[...]              # output layer
        if tanh_reg:
            reg = reg_ref[0]
            inv_reg = reg_ref[1]          # precomputed reciprocal -> VPU mul only
            if bf16_act:
                h = reg * jnp.tanh((h * inv_reg).astype(jnp.bfloat16)
                                   ).astype(jnp.float32)
            else:
                h = reg * jnp.tanh(h * inv_reg)
        out_ref[...] = h.astype(out_ref.dtype)

    return kernel


# -----------------------------------------------------------------------------
# Forward wrapper (call with params from prepare_ode_params)
# -----------------------------------------------------------------------------
def ode_forward(x, params, reg_factor, *, out_dim, tanh_reg=True,
                tile_b=None, bf16_act=False, mxu_highest=True):
    """Fused Pallas forward of the ODE MLP.

    x:          [B, input_shape] float32
    params:     tuple from prepare_ode_params()
    reg_factor: scalar float32 (learnable parameter of the module)
    out_dim:    true (unpadded) output feature count (static)
    """
    w_in, b_slab, wh, w_out, b_out = params
    num_hidden = b_slab.shape[0] - 1          # static (shape-derived)
    p_in = w_in.shape[0]
    p_hid = w_in.shape[1]
    p_out = w_out.shape[1]

    B, in_dim = x.shape
    assert in_dim <= p_in

    # Batch tile: multiple of 8 sublanes.  Default targets ~2 grid steps so both
    # v7x TensorCores get work while v5e/v6e amortize per-step overhead; capped
    # so the double-buffered activation tiles stay small in VMEM.
    b8 = _round_up(B, _SUBLANE)
    if tile_b is None:
        tb = min(1024, _round_up(pl.cdiv(b8, 2), _SUBLANE))
    else:
        tb = min(_round_up(tile_b, _SUBLANE), b8)
    bp = _round_up(b8, tb)
    grid = (bp // tb,)

    x_p = jnp.pad(x, ((0, bp - B), (0, p_in - in_dim)))

    reg = jnp.asarray(reg_factor, jnp.float32)
    inv_reg = (1.0 / reg) if tanh_reg else jnp.float32(1.0)
    reg_arr = jnp.stack([reg, inv_reg]).astype(jnp.float32)     # SMEM scalars

    kernel = _make_ode_kernel(num_hidden, tanh_reg, bf16_act, mxu_highest)

    xmap = lambda i, reg_sm: (i, 0)          # batch tiles march over the grid
    omap = lambda i, reg_sm: (i, 0)
    cmap2 = lambda i, reg_sm: (0, 0)         # weights/biases stay resident
    cmap3 = lambda i, reg_sm: (0, 0, 0)

    out_p = pl.pallas_call(
        kernel,
        out_shape=jax.ShapeDtypeStruct((bp, p_out), jnp.float32),
        grid_spec=pltpu.PrefetchScalarGridSpec(
            num_scalar_prefetch=1,
            grid=grid,
            in_specs=[
                pl.BlockSpec((tb, p_in), xmap),          # x tile
                pl.BlockSpec((p_in, p_hid), cmap2),      # w_in
                pl.BlockSpec(b_slab.shape, cmap3),       # bias slab (in + hidden)
                pl.BlockSpec(wh.shape, cmap3),           # hidden weight slab
                pl.BlockSpec((p_hid, p_out), cmap2),     # w_out
                pl.BlockSpec((1, p_out), cmap2),         # b_out
            ],
            out_specs=pl.BlockSpec((tb, p_out), omap),   # lane-dense store
        ),
        # VMEM footprint: (L+2) weight mats + biases (double-buffered) plus
        # 2x(tb, P) activation tiles -- well under the scoped default on all of
        # v5e/v6e/v7x at these sizes.
        compiler_params=pltpu.CompilerParams(
            dimension_semantics=("parallel",)),
    )(reg_arr, x_p, w_in, b_slab, wh, w_out, b_out)

    return out_p[:B, :out_dim]


# -----------------------------------------------------------------------------
# Reference + test harness
# -----------------------------------------------------------------------------
def _init_linear(key, fan_in, fan_out):
    """Deterministic PyTorch-style Linear init (uniform +-1/sqrt(fan_in))."""
    kw, kb = jax.random.split(key)
    bound = 1.0 / jnp.sqrt(jnp.float32(fan_in))
    # torch weight is [out, in]; we store transposed [in, out] for the kernel.
    w = jax.random.uniform(kw, (fan_in, fan_out), jnp.float32, -bound, bound)
    b = jax.random.uniform(kb, (1, fan_out), jnp.float32, -bound, bound)
    return w, b


def _reference(x, weights, biases, reg_factor, tanh_reg):
    h = x
    n = len(weights)
    for i, (w, b) in enumerate(zip(weights, biases)):
        h = jnp.dot(h, w, precision=jax.lax.Precision.HIGHEST) + b
        if i < n - 1:
            h = jnp.tanh(h)
    if tanh_reg:
        h = reg_factor * jnp.tanh(h / reg_factor)
    return h


def _build_model(key, input_shape, output_shape, ode_layers, ode_width):
    dims = [input_shape, ode_width] + [ode_width] * ode_layers + [output_shape]
    keys = jax.random.split(key, len(dims) - 1)
    weights, biases = [], []
    for i in range(len(dims) - 1):
        w, b = _init_linear(keys[i], dims[i], dims[i + 1])
        weights.append(w)
        biases.append(b)
    return weights, biases


if __name__ == "__main__":
    key = jax.random.PRNGKey(0)
    k_x1, k_m1, k_x2, k_m2 = jax.random.split(key, 4)

    # --- Config 1: small shapes consistent with the module, 2 hidden layers ---
    batch, input_shape, output_shape = 64, 16, 16
    ode_layers, ode_width = 2, 32
    tanh_reg, reg_factor = True, 1.0

    x = jax.random.normal(k_x1, (batch, input_shape), jnp.float32)
    weights, biases = _build_model(k_m1, input_shape, output_shape,
                                   ode_layers, ode_width)

    params = prepare_ode_params(weights, biases)          # one-time prep
    fwd = jax.jit(functools.partial(ode_forward, out_dim=output_shape,
                                    tanh_reg=tanh_reg))
    out = jax.block_until_ready(fwd(x, params, jnp.float32(reg_factor)))
    ref = _reference(x, weights, biases, jnp.float32(reg_factor), tanh_reg)
    assert out.shape == (batch, output_shape)
    assert jnp.allclose(out, ref, atol=1e-5, rtol=1e-5), (
        float(jnp.max(jnp.abs(out - ref))))

    # --- Config 2: no hidden layers (exercises the dummy-slab path) ---
    batch2, in2, out2 = 8, 8, 8
    x2 = jax.random.normal(k_x2, (batch2, in2), jnp.float32)
    w2, b2 = _build_model(k_m2, in2, out2, ode_layers=0, ode_width=24)
    params2 = prepare_ode_params(w2, b2)
    fwd2 = jax.jit(functools.partial(ode_forward, out_dim=out2, tanh_reg=False))
    out_v2 = jax.block_until_ready(fwd2(x2, params2, jnp.float32(1.0)))
    ref2 = _reference(x2, w2, b2, jnp.float32(1.0), tanh_reg=False)
    assert out_v2.shape == (batch2, out2)
    assert jnp.allclose(out_v2, ref2, atol=1e-5, rtol=1e-5), (
        float(jnp.max(jnp.abs(out_v2 - ref2))))

    print("KERNEL_OK")
</pallas_src>

<mosaic_0001>
module attributes {stable_mosaic.version = 11 : i64} {
  func.func @kernel(%arg0: i32, %arg1: memref<2xf32, #tpu.memory_space<smem>>, %arg2: memref<32x128xf32, #tpu.memory_space<vmem>>, %arg3: memref<128x128xf32, #tpu.memory_space<vmem>>, %arg4: memref<3x1x128xf32, #tpu.memory_space<vmem>>, %arg5: memref<2x128x128xf32, #tpu.memory_space<vmem>>, %arg6: memref<128x128xf32, #tpu.memory_space<vmem>>, %arg7: memref<1x128xf32, #tpu.memory_space<vmem>>, %arg8: memref<32x128xf32, #tpu.memory_space<vmem>>) attributes {dimension_semantics = [#tpu.dimension_semantics<parallel>], iteration_bounds = array<i64: 2>, scalar_prefetch = 1 : i64, scratch_operands = 0 : i64, tpu.core_type = #tpu.core_type<tc>, window_params = [{transform_indices = @transform_0, window_bounds = array<i64: 32, 128>}, {pipeline_mode = #tpu.pipeline_mode<synchronous>, transform_indices = @transform_1, window_bounds = array<i64: 128, 128>}, {pipeline_mode = #tpu.pipeline_mode<synchronous>, transform_indices = @transform_2, window_bounds = array<i64: 3, 1, 128>}, {pipeline_mode = #tpu.pipeline_mode<synchronous>, transform_indices = @transform_3, window_bounds = array<i64: 2, 128, 128>}, {pipeline_mode = #tpu.pipeline_mode<synchronous>, transform_indices = @transform_4, window_bounds = array<i64: 128, 128>}, {pipeline_mode = #tpu.pipeline_mode<synchronous>, transform_indices = @transform_5, window_bounds = array<i64: 1, 128>}, {transform_indices = @transform_6, window_bounds = array<i64: 32, 128>}]} {
    %c0 = arith.constant 0 : index
    %c0_0 = arith.constant 0 : index
    %0 = vector.load %arg2[%c0, %c0_0] : memref<32x128xf32, #tpu.memory_space<vmem>>, vector<32x128xf32>
    %c0_1 = arith.constant 0 : index
    %c0_2 = arith.constant 0 : index
    %1 = vector.load %arg3[%c0_1, %c0_2] : memref<128x128xf32, #tpu.memory_space<vmem>>, vector<128x128xf32>
    %cst = arith.constant dense<0.000000e+00> : vector<32x128xf32>
    %2 = tpu.matmul %0, %1, %cst {dimension_numbers = #tpu.dot_dimension_numbers<[1], [0], [0], [1], [0, 0, 1, 1], [], []>, precision = #tpu.contract_precision<fp32>} : vector<32x128xf32>, vector<128x128xf32>, vector<32x128xf32> -> vector<32x128xf32>
    %c0_3 = arith.constant 0 : index
    %c0_4 = arith.constant 0 : index
    %c0_5 = arith.constant 0 : index
    %3 = vector.load %arg4[%c0_3, %c0_4, %c0_5] : memref<3x1x128xf32, #tpu.memory_space<vmem>>, vector<1x1x128xf32>
    %4 = vector.shape_cast %3 : vector<1x1x128xf32> to vector<1x128xf32>
    %5 = vector.broadcast %4 : vector<1x128xf32> to vector<32x128xf32>
    %6 = arith.addf %2, %5 : vector<32x128xf32>
    %7 = math.tanh %6 : vector<32x128xf32>
    %c0_6 = arith.constant 0 : index
    %c0_7 = arith.constant 0 : index
    %c0_8 = arith.constant 0 : index
    %8 = vector.load %arg5[%c0_6, %c0_7, %c0_8] : memref<2x128x128xf32, #tpu.memory_space<vmem>>, vector<1x128x128xf32>
    %9 = vector.shape_cast %8 : vector<1x128x128xf32> to vector<128x128xf32>
    %cst_9 = arith.constant dense<0.000000e+00> : vector<32x128xf32>
    %10 = tpu.matmul %7, %9, %cst_9 {dimension_numbers = #tpu.dot_dimension_numbers<[1], [0], [0], [1], [0, 0, 1, 1], [], []>, precision = #tpu.contract_precision<fp32>} : vector<32x128xf32>, vector<128x128xf32>, vector<32x128xf32> -> vector<32x128xf32>
    %c1 = arith.constant 1 : index
    %c0_10 = arith.constant 0 : index
    %c0_11 = arith.constant 0 : index
    %11 = vector.load %arg4[%c1, %c0_10, %c0_11] : memref<3x1x128xf32, #tpu.memory_space<vmem>>, vector<1x1x128xf32>
    %12 = vector.shape_cast %11 : vector<1x1x128xf32> to vector<1x128xf32>
    %13 = vector.broadcast %12 : vector<1x128xf32> to vector<32x128xf32>
    %14 = arith.addf %10, %13 : vector<32x128xf32>
    %15 = math.tanh %14 : vector<32x128xf32>
    %c1_12 = arith.constant 1 : index
    %c0_13 = arith.constant 0 : index
    %c0_14 = arith.constant 0 : index
    %16 = vector.load %arg5[%c1_12, %c0_13, %c0_14] : memref<2x128x128xf32, #tpu.memory_space<vmem>>, vector<1x128x128xf32>
    %17 = vector.shape_cast %16 : vector<1x128x128xf32> to vector<128x128xf32>
    %cst_15 = arith.constant dense<0.000000e+00> : vector<32x128xf32>
    %18 = tpu.matmul %15, %17, %cst_15 {dimension_numbers = #tpu.dot_dimension_numbers<[1], [0], [0], [1], [0, 0, 1, 1], [], []>, precision = #tpu.contract_precision<fp32>} : vector<32x128xf32>, vector<128x128xf32>, vector<32x128xf32> -> vector<32x128xf32>
    %c2 = arith.constant 2 : index
    %c0_16 = arith.constant 0 : index
    %c0_17 = arith.constant 0 : index
    %19 = vector.load %arg4[%c2, %c0_16, %c0_17] : memref<3x1x128xf32, #tpu.memory_space<vmem>>, vector<1x1x128xf32>
    %20 = vector.shape_cast %19 : vector<1x1x128xf32> to vector<1x128xf32>
    %21 = vector.broadcast %20 : vector<1x128xf32> to vector<32x128xf32>
    %22 = arith.addf %18, %21 : vector<32x128xf32>
    %23 = math.tanh %22 : vector<32x128xf32>
    %c0_18 = arith.constant 0 : index
    %c0_19 = arith.constant 0 : index
    %24 = vector.load %arg6[%c0_18, %c0_19] : memref<128x128xf32, #tpu.memory_space<vmem>>, vector<128x128xf32>
    %cst_20 = arith.constant dense<0.000000e+00> : vector<32x128xf32>
    %25 = tpu.matmul %23, %24, %cst_20 {dimension_numbers = #tpu.dot_dimension_numbers<[1], [0], [0], [1], [0, 0, 1, 1], [], []>, precision = #tpu.contract_precision<fp32>} : vector<32x128xf32>, vector<128x128xf32>, vector<32x128xf32> -> vector<32x128xf32>
    %c0_21 = arith.constant 0 : index
    %c0_22 = arith.constant 0 : index
    %26 = vector.load %arg7[%c0_21, %c0_22] : memref<1x128xf32, #tpu.memory_space<vmem>>, vector<1x128xf32>
    %27 = vector.broadcast %26 : vector<1x128xf32> to vector<32x128xf32>
    %28 = arith.addf %25, %27 : vector<32x128xf32>
    %c0_23 = arith.constant 0 : index
    %29 = memref.load %arg1[%c0_23] : memref<2xf32, #tpu.memory_space<smem>>
    %c1_24 = arith.constant 1 : index
    %30 = memref.load %arg1[%c1_24] : memref<2xf32, #tpu.memory_space<smem>>
    %31 = vector.broadcast %30 : f32 to vector<32x128xf32>
    %32 = arith.mulf %28, %31 : vector<32x128xf32>
    %33 = math.tanh %32 : vector<32x128xf32>
    %34 = vector.broadcast %29 : f32 to vector<32x128xf32>
    %35 = arith.mulf %34, %33 : vector<32x128xf32>
    %c0_25 = arith.constant 0 : index
    %c0_26 = arith.constant 0 : index
    %36 = vector.load %arg8[%c0_25, %c0_26] : memref<32x128xf32, #tpu.memory_space<vmem>>, vector<32x128xf32>
    tpu.vector_store %arg8[%c0_25, %c0_26], %35 {strides = array<i32>} : memref<32x128xf32, #tpu.memory_space<vmem>>, vector<32x128xf32>,
    return
  }
  func.func @transform_0(%arg0: i32, %arg1: memref<2xf32, #tpu.memory_space<smem>>) -> (i32, i32) {
    %c0_i32 = arith.constant 0 : i32
    %c0_i32_0 = arith.constant 0 : i32
    return %arg0, %c0_i32 : i32, i32
  }
  func.func @transform_1(%arg0: i32, %arg1: memref<2xf32, #tpu.memory_space<smem>>) -> (i32, i32) {
    %c0_i32 = arith.constant 0 : i32
    %c0_i32_0 = arith.constant 0 : i32
    %c0_i32_1 = arith.constant 0 : i32
    return %c0_i32, %c0_i32_0 : i32, i32
  }
  func.func @transform_2(%arg0: i32, %arg1: memref<2xf32, #tpu.memory_space<smem>>) -> (i32, i32, i32) {
    %c0_i32 = arith.constant 0 : i32
    %c0_i32_0 = arith.constant 0 : i32
    %c0_i32_1 = arith.constant 0 : i32
    %c0_i32_2 = arith.constant 0 : i32
    return %c0_i32, %c0_i32_0, %c0_i32_1 : i32, i32, i32
  }
  func.func @transform_3(%arg0: i32, %arg1: memref<2xf32, #tpu.memory_space<smem>>) -> (i32, i32, i32) {
    %c0_i32 = arith.constant 0 : i32
    %c0_i32_0 = arith.constant 0 : i32
    %c0_i32_1 = arith.constant 0 : i32
    %c0_i32_2 = arith.constant 0 : i32
    return %c0_i32, %c0_i32_0, %c0_i32_1 : i32, i32, i32
  }
  func.func @transform_4(%arg0: i32, %arg1: memref<2xf32, #tpu.memory_space<smem>>) -> (i32, i32) {
    %c0_i32 = arith.constant 0 : i32
    %c0_i32_0 = arith.constant 0 : i32
    %c0_i32_1 = arith.constant 0 : i32
    return %c0_i32, %c0_i32_0 : i32, i32
  }
  func.func @transform_5(%arg0: i32, %arg1: memref<2xf32, #tpu.memory_space<smem>>) -> (i32, i32) {
    %c0_i32 = arith.constant 0 : i32
    %c0_i32_0 = arith.constant 0 : i32
    %c0_i32_1 = arith.constant 0 : i32
    return %c0_i32, %c0_i32_0 : i32, i32
  }
  func.func @transform_6(%arg0: i32, %arg1: memref<2xf32, #tpu.memory_space<smem>>) -> (i32, i32) {
    %c0_i32 = arith.constant 0 : i32
    %c0_i32_0 = arith.constant 0 : i32
    return %arg0, %c0_i32 : i32, i32
  }
}

</mosaic_0001>

<bundles_post_ra>
// kernel: ode_forward.1
= control target key start
LH: loop header
LB: loop body
LE: loop exit
PB: predicated region body
PF: predicated region fallthrough
CT: control target
= control target key end

     0   :  { %s7569_s0 = inlined_call_operand.vmem [shape: f32[2], index: 0, kind: input, shape index: {}]   ;;  %s7570_s1 = inlined_call_operand.vmem [shape: f32[64,128], index: 1, kind: input, shape index: {}]   ;;  %s7571_s2 = inlined_call_operand.vmem [shape: f32[128,128], index: 2, kind: input, shape index: {}]   ;;  %s7572_s3 = inlined_call_operand.vmem [shape: f32[3,1,128], index: 3, kind: input, shape index: {}]   ;;  %s7573_s4 = inlined_call_operand.hbm [shape: f32[2,128,128], index: 4, kind: input, shape index: {}]   ;;  %s7574_s5 = inlined_call_operand.hbm [shape: f32[128,128], index: 5, kind: input, shape index: {}]   ;;  %s7575_s6 = inlined_call_operand.vmem [shape: f32[1,128], index: 6, kind: input, shape index: {}]   ;;  %s7576_s7 = inlined_call_operand.vmem [shape: f32[64,128], index: 7, kind: output, shape index: {}]  }
   0x1   :  { %s12_s26 = sshll.u32 %s7569_s0, 4  ;;  %s13_s26 = int_to_ptr.vmem [resolvable:$true] %s12_s26 }
   0x2   :  { %s5923_s27 = scalar_lea.vmem %s13_s26, 16  ;;  %p5928_p1 = scmp.lt.s32.totalorder %s13_s26, %s13_s26 }
   0x3   :  { %p5924_p0 = scmp.ne.s32.totalorder %s13_s26, %s5923_s27  ;;  %p5929_p2 = scmp.lt.s32.totalorder %s5923_s27, %s5923_s27 }
   0x5   :  { %p5930_p3 = por %p5929_p2, %p5928_p1 }
   0x7   :  { %p5931_p4 = pnand %p5930_p3, %p5924_p0 }
   0x9   :  { %5934 = shalt.err (!%p5931_p4)  }
   0xa   :  { %s6009_s28 = smov [#allocation3]  }
   0xb   :  { %15 = dma.vmem_to_smem %s13_s26, 16, %s6009_s28, [#allocation2] }
   0xc   :  { %5995 = dma.done.wait [#allocation2], 16 }
   0xd   :  { %5996 = vsyncadd [#allocation2], 4294967280 }
   0xe   :  { %17 = sfence }
   0xf   :  { %18 = vsyncpa [#allocation5], 0 }
  0x10   :  { %19 = vsyncpa [#allocation7], 0  ;;  %s6057_s29 = smov 0  }
  0x11 LB: > { %s3581_s0 = sadd.s32 4294967295, %s6007_s29   ;;  %p3583_p5 = scmp.ge.s32.totalorder %s6007_s29, 1  ;;  %s6007_s29 = sphi %s6057_s29, %s25_s29  }
  0x12   : > { %p187_p6 = scmp.lt.s32.totalorder %s6007_s29, 3  ;;  %s6010_s30 = smov [#allocation4]  }
  0x13   : > { %s205_s8 = sshll.u32 %s6010_s30, 4  ;;  %p6071_p8 = scmp.eq.s32.totalorder %s3581_s0, 0  ;;  %s206_s8 = int_to_ptr.vmem [resolvable:$true] %s205_s8 }
  0x14   : > { %p6065_p7 = pnand %p3583_p5, %p187_p6  ;;  %s6011_s11 = smov [#allocation6]  }
  0x15   : > { %s7628_s10 = scalar_select %p6071_p8, 1, 0 }
  0x16   : > { %s7627_s9 = scalar_select %p6065_p7, 1, 0 }
  0x17   : > { %p5867_p9 = pneg %p6065_p7  ;;  %s218_s12 = sshll.u32 %s6011_s11, 4  ;;  %s6083_s12 = int_to_ptr.vmem [resolvable:$true] %s218_s12 }
  0x18   : > { %s5935_s16 = scalar_lea.hbm %s7573_s4, 4096 }
  0x19   : > { %p6079_p10 = pnand %p6071_p8, %p5867_p9  ;;  %p5936_p11 = scmp.ne.s32.totalorder %s7573_s4, %s5935_s16 }
  0x1a   : > { %p5942_p1 = scmp.lt.u32.totalorder %s5935_s16, %s7573_s4 }
  0x1b   : > { %p5937_p12 = pneg %p6079_p10 }
  0x1d   : > { %p5938_p13 = pnand %p5937_p12, %p5936_p11 }
  0x1f   : > { %p5939_p0 = pneg %p5938_p13 }
  0x21   : > { %p5944_p2 = pnand %p5942_p1, %p5939_p0 }
  0x23   : > { %5947 = shalt.err (!%p5944_p2)
}
  0x24   : > { %s5948_s21 = scalar_lea.vmem %s206_s8, 4096  ;;  %p5956_p6 = scmp.lt.s32.totalorder %s206_s8, %s206_s8 }
  0x25   : > { %p5949_p3 = scmp.ne.s32.totalorder %s206_s8, %s5948_s21  ;;  %p5957_p9 = scmp.lt.s32.totalorder %s5948_s21, %s5948_s21 }
  0x27   : > { %p5951_p4 = pnand %p5949_p3, %p5937_p12  ;;  %p5958_p8 = por %p5957_p9, %p5956_p6 }
  0x29   : > { %p5952_p5 = pneg %p5951_p4 }
  0x2b   : > { %p5959_p7 = pnand %p5958_p8, %p5952_p5 }
  0x2d   : > { %5962 = shalt.err (!%p5959_p7)
}
  0x2e   : > { %s6012_s22 = smov 128   ;;  %s6013_s23 = smov 8  }
  0x2f   : > { %5870 = dma.hbm_to_vmem [thread:$0]  (!%p6079_p10), %s7573_s4, 4096, %s206_s8, [#allocation5], %s6012_s22, %s6012_s22, %s6013_s23  }
  0x30   : > { %s5963_s28 = scalar_lea.hbm %s7574_s5, 2048 }
  0x31   : > { %p5964_p11 = scmp.ne.s32.totalorder %s7574_s5, %s5963_s28  ;;  %p5970_p13 = scmp.lt.u32.totalorder %s5963_s28, %s7574_s5 }
  0x33   : > { %p5966_p7 = pnand %p5964_p11, %p5937_p12 }
  0x35   : > { %p5967_p8 = pneg %p5966_p7 }
  0x37   : > { %p5972_p0 = pnand %p5970_p13, %p5967_p8 }
  0x39   : > { %5975 = shalt.err (!%p5972_p0)
}
  0x3a   : > { %s5976_s8 = scalar_lea.vmem %s6083_s12, 2048  ;;  %p5984_p4 = scmp.lt.s32.totalorder %s6083_s12, %s6083_s12 }
  0x3b   : > { %p5977_p1 = scmp.ne.s32.totalorder %s6083_s12, %s5976_s8  ;;  %p5985_p5 = scmp.lt.s32.totalorder %s5976_s8, %s5976_s8 }
  0x3d   : > { %p5979_p2 = pnand %p5977_p1, %p5937_p12  ;;  %p5986_p6 = por %p5985_p5, %p5984_p4 }
  0x3f   : > { %p5980_p3 = pneg %p5979_p2 }
  0x41   : > { %p5987_p9 = pnand %p5986_p6, %p5980_p3 }
  0x43   : > { %5990 = shalt.err (!%p5987_p9)
}
  0x44   : > { %5873 = dma.hbm_to_vmem [thread:$0]  (!%p6079_p10), %s7574_s5, 2048, %s6083_s12, [#allocation7], %s6012_s22, %s6012_s22, %s6013_s23  }
  0x45   : > { %p7630_p11 = scmp.ne.s32.totalorder %s7627_s9, 0 }
  0x47   : > { %246 = sbr.rel (%p7630_p11) target bundleno = 1706 (0x6aa), region = 44 }
  0x4e   : > { %p7631_p7 = scmp.ne.s32.totalorder %s7628_s10, 0 }
  0x50   : > { %5998 = dma.done.wait (%p7631_p7), [#allocation5], 4096  }
  0x51   : > { %6000 = vsyncadd (%p7631_p7), [#allocation5], 4294963200 }
  0x52   : > { %6002 = dma.done.wait (%p7631_p7), [#allocation7], 2048  }
  0x53   : > { %6004 = vsyncadd (%p7631_p7), [#allocation7], 4294965248  ;;  %s3590_s13 = sshll.u32 %s3581_s0, 2  ;;  %v296_v0 = vld [vmem:[%s7571_s2] sm:$0xff]  ;;  %v297_v1 = vld [vmem:[%s7571_s2 + $0x8] sm:$0xff]  ;;  %s3600_s17 = sld [smem:[#allocation3 + $0x1]] }
  0x54   : > { %p281_p12 = scmp.lt.s32.totalorder %s3590_s13, 7  ;;  %v298_v2 = vld [vmem:[%s7571_s2 + $0x10] sm:$0xff]  ;;  %v320_v3 = vand.u32 4294901760, %v296_v0  ;;  %v323_v4 = vand.u32 4294901760, %v297_v1  ;;  %v299_v5 = vld [vmem:[%s7571_s2 + $0x18] sm:$0xff]  ;;  %v300_v7 = vld [vmem:[%s7571_s2 + $0x20] sm:$0xff] }
  0x55   : > { %v326_v6 = vand.u32 4294901760, %v298_v2  ;;  %v301_v8 = vld [vmem:[%s7571_s2 + $0x28] sm:$0xff]  ;;  %v329_v9 = vand.u32 4294901760, %v299_v5  ;;  %v332_v11 = vand.u32 4294901760, %v300_v7  ;;  %v6179_v14 = vld [vmem:[%s7571_s2 + $0x30] sm:$0xff]  ;;  %v6184_v15 = vld [vmem:[%s7571_s2 + $0x38] sm:$0xff] }
  0x56   : > { %s7684_s13 = smov (!%p281_p12, %s3590_s13), 7  ;;  %v6172_v10 = vpack.c.bf16 %v323_v4, %v320_v3  ;;  %v335_v12 = vand.u32 4294901760, %v301_v8  ;;  %v338_v19 = vand.u32 4294901760, %v6179_v14  ;;  %v341_v20 = vand.u32 4294901760, %v6184_v15  ;;  %v6199_v21 = vld [vmem:[%s7571_s2 + $0x40] sm:$0xff]  ;;  %v6204_v22 = vld [vmem:[%s7571_s2 + $0x48] sm:$0xff] }
  0x57   : > { %s3591_s9 = sshll.u32 %s7684_s13, 3  ;;  %v6174_v13 = vpack.c.bf16 %v329_v9, %v326_v6  ;;  %v6212_v26 = vsub.f32 %v296_v0, %v320_v3  ;;  %v6214_v27 = vsub.f32 %v297_v1, %v323_v4  ;;  %v344_v29 = vand.u32 4294901760, %v6199_v21  ;;  %v306_v31 = vld [vmem:[%s7571_s2 + $0x50] sm:$0xff]  ;;  %v307_v32 = vld [vmem:[%s7571_s2 + $0x58] sm:$0xff]  ;;  %v308_v37 = vld [vmem:[%s7571_s2 + $0x60] sm:$0xff]  ;;  %s3483_s19 = sld [smem:[#allocation3]] }
  0x58   : > { %s6170_s30 = scalar_lea.vmem %s7570_s1, %s3591_s9  ;;  %4996 = vmatprep.subr.bf16.mxu0 %v6172_v10  ;;  %v6192_v18 = vpack.c.bf16 %v335_v12, %v332_v11  ;;  %v6221_v28 = vpack.c.bf16 %v341_v20, %v338_v19  ;;  %v347_v30 = vand.u32 4294901760, %v6204_v22  ;;  %v6236_v35 = vsub.f32 %v298_v2, %v326_v6  ;;  %v309_v43 = vld [vmem:[%s7571_s2 + $0x68] sm:$0xff]  ;;  %v310_v44 = vld [vmem:[%s7571_s2 + $0x70] sm:$0xff]  ;;  %v311_v47 = vld [vmem:[%s7571_s2 + $0x78] sm:$0xff]  ;;  %s290_s10 = scalar_lea.vmem %s7576_s7, %s3591_s9 }
  0x59   : > { %v292_v16 = vld [vmem:[%s6170_s30] sm:$0xff]  ;;  %4998 = vmatpush3.bf16.msra.mxu0 %v6172_v10  ;;  %v293_v24 = vld [vmem:[%s6170_s30 + $0x8] sm:$0xff]  ;;  %v350_v36 = vand.u32 4294901760, %v306_v31  ;;  %v443_v39 = vand.u32 4294901760, %v6212_v26  ;;  %v450_v40 = vand.u32 4294901760, %v6214_v27  ;;  %v353_v42 = vand.u32 4294901760, %v307_v32 }
  0x5a   : > { %v6189_v17 = vand.u32 4294901760, %v292_v16  ;;  %5000 = vmatprep.subr.bf16.mxu0 %v6174_v13  ;;  %v6234_v34 = vand.u32 4294901760, %v293_v24  ;;  %v6245_v41 = vpack.c.bf16 %v347_v30, %v344_v29  ;;  %v6253_v45 = vsub.f32 %v299_v5, %v329_v9  ;;  %v294_v63 = vld [vmem:[%s6170_s30 + $0x10] sm:$0xff] }
  0x5b   : > { %v6255_v46 = vsub.f32 %v300_v7, %v332_v11  ;;  %v457_v49 = vand.u32 4294901760, %v6236_v35  ;;  %v6264_v50 = vsub.f32 %v301_v8, %v335_v12  ;;  %v356_v51 = vand.u32 4294901760, %v308_v37  ;;  %v295_v7 = vld [vmem:[%s6170_s30 + $0x18] sm:$0xff] }
  0x5c   : > { %v6207_v23 = vsub.f32 %v292_v16, %v6189_v17  ;;  %v6261_v48 = vsub.f32 %v293_v24, %v6234_v34  ;;  %v359_v52 = vand.u32 4294901760, %v309_v43  ;;  %v362_v53 = vand.u32 4294901760, %v310_v44 }
  0x5d   : > { %5002 = vmatpush3.bf16.msra.mxu0 %v6174_v13  ;;  %v444_v54 = vsub.f32 %v6212_v26, %v443_v39  ;;  %v451_v55 = vsub.f32 %v6214_v27, %v450_v40  ;;  %v6274_v56 = vpack.c.bf16 %v353_v42, %v350_v36  ;;  %v365_v57 = vand.u32 4294901760, %v311_v47 }
  0x5e   : > { %v7582_v25 = vand.u32 4294901760, %v6207_v23  ;;  %5004 = vmatprep.subr.bf16.mxu0 %v6192_v18  ;;  %v464_v58 = vand.u32 4294901760, %v6253_v45  ;;  %v471_v59 = vand.u32 4294901760, %v6255_v46  ;;  %v7581_v60 = vand.u32 4294901760, %v6261_v48 }
  0x5f   : > { %v6282_v61 = vsub.f32 %v6236_v35, %v457_v49  ;;  %v478_v62 = vand.u32 4294901760, %v6264_v50  ;;  %v6287_v0 = vpack.c.bf16 %v359_v52, %v356_v51  ;;  %v445_v1 = vand.u32 4294901760, %v444_v54 }
  0x60   : > { %v403_v33 = vsub.f32 %v6207_v23, %v7582_v25  ;;  %v452_v2 = vand.u32 4294901760, %v451_v55  ;;  %v6290_v3 = vpack.c.bf16 %v365_v57, %v362_v53  ;;  %v465_v4 = vsub.f32 %v6253_v45, %v464_v58 }
  0x61   : > { %5006 = vmatpush3.bf16.msra.mxu0 %v6192_v18  ;;  %v472_v5 = vsub.f32 %v6255_v46, %v471_v59  ;;  %v6294_v6 = vand.u32 4294901760, %v294_v63  ;;  %v413_v8 = vsub.f32 %v6261_v48, %v7581_v60  ;;  %v459_v9 = vand.u32 4294901760, %v6282_v61 }
  0x62   : > { %v404_v38 = vand.u32 4294901760, %v403_v33  ;;  %5008 = vmatprep.subr.bf16.mxu0 %v6221_v28  ;;  %v479_v11 = vsub.f32 %v6264_v50, %v478_v62  ;;  %v6305_v12 = vsub.f32 %v6179_v14, %v338_v19  ;;  %v6310_v16 = vsub.f32 %v6184_v15, %v341_v20 }
  0x63   : > { %v6313_v24 = vsub.f32 %v6199_v21, %v344_v29  ;;  %v6316_v33 = vsub.f32 %v6204_v22, %v347_v30  ;;  %v5027_v54 = vpack.c.bf16 %v452_v2, %v445_v1  ;;  %v6322_v55 = vsub.f32 %v306_v31, %v350_v36 }
  0x64   : > { %4115 = vmatprep.mubr.f32.mxu0 %v404_v38  ;;  %v6319_v38 = vsub.f32 %v294_v63, %v6294_v6  ;;  %v6324_v14 = vsub.f32 %v307_v32, %v353_v42  ;;  %v6326_v19 = vand.u32 4294901760, %v295_v7  ;;  %v6329_v15 = vsub.f32 %v308_v37, %v356_v51 }
  0x65   : > { %5010 = vmatpush3.bf16.msra.mxu0 %v6221_v28  ;;  %v6331_v20 = vsub.f32 %v309_v43, %v359_v52  ;;  %v6334_v22 = vsub.f32 %v310_v44, %v362_v53  ;;  %v414_v29 = vand.u32 4294901760, %v413_v8  ;;  %v466_v30 = vand.u32 4294901760, %v465_v4 }
  0x66   : > { %5012 = vmatprep.subr.bf16.mxu0 %v6245_v41  ;;  %v7580_v21 = vand.u32 4294901760, %v6319_v38  ;;  %v6336_v61 = vsub.f32 %v311_v47, %v365_v57  ;;  %v6339_v31 = vsub.f32 %v295_v7, %v6326_v19  ;;  %v485_v32 = vand.u32 4294901760, %v6305_v12 }
  0x67   : > { %v492_v36 = vand.u32 4294901760, %v6310_v16  ;;  %v499_v37 = vand.u32 4294901760, %v6313_v24  ;;  %v506_v42 = vand.u32 4294901760, %v6316_v33  ;;  %v513_v43 = vand.u32 4294901760, %v6322_v55 }
  0x68   : > { %v520_v44 = vand.u32 4294901760, %v6324_v14  ;;  %v423_v47 = vsub.f32 %v6319_v38, %v7580_v21  ;;  %v7584_v51 = vand.u32 4294901760, %v6339_v31  ;;  %v527_v52 = vand.u32 4294901760, %v6329_v15 }
  0x69   : > { %5014 = vmatpush3.bf16.msra.mxu0 %v6245_v41  ;;  %v534_v53 = vand.u32 4294901760, %v6331_v20  ;;  %v541_v57 = vand.u32 4294901760, %v6334_v22  ;;  %v6360_v63 = vpack.c.bf16 %v450_v40, %v443_v39  ;;  %v548_v1 = vand.u32 4294901760, %v6336_v61 }
  0x6a   : > { %5016 = vmatprep.subr.bf16.mxu0 %v6274_v56  ;;  %v6365_v2 = vpack.c.bf16 %v464_v58, %v457_v49  ;;  %v6367_v4 = vpack.c.bf16 %v478_v62, %v471_v59  ;;  %v6369_v7 = vpack.c.bf16 %v492_v36, %v485_v32  ;;  %v433_v8 = vsub.f32 %v6339_v31, %v7584_v51 }
  0x6b   : > { %v6374_v21 = vpack.c.bf16 %v506_v42, %v499_v37  ;;  %v6376_v60 = vpack.c.bf16 %v520_v44, %v513_v43  ;;  %v6378_v39 = vpack.c.bf16 %v534_v53, %v527_v52  ;;  %v473_v40 = vand.u32 4294901760, %v472_v5 }
  0x6c   : > { %7632 = vst [vmem:[#allocation11_spill] sm:$0xff] %v6369_v7  ;;  %v480_v25 = vand.u32 4294901760, %v479_v11  ;;  %v424_v49 = vand.u32 4294901760, %v423_v47  ;;  %v6381_v58 = vpack.c.bf16 %v548_v1, %v541_v57  ;;  %v5031_v59 = vpack.c.bf16 %v466_v30, %v459_v9 }
  0x6d   : > { %5018 = vmatpush3.bf16.msra.mxu0 %v6274_v56  ;;  %7633 = vst [vmem:[#allocation12_spill] sm:$0xff] %v6374_v21  ;;  %7634 = vst [vmem:[#allocation13_spill] sm:$0xff] %v6376_v60  ;;  %v486_v62 = vsub.f32 %v6305_v12, %v485_v32  ;;  %v493_v7 = vsub.f32 %v6310_v16, %v492_v36  ;;  %v434_v51 = vand.u32 4294901760, %v433_v8 }
  0x6e   : > { %5020 = vmatprep.subr.bf16.mxu0 %v6287_v0  ;;  %7635 = vst [vmem:[#allocation14_spill] sm:$0xff] %v6378_v39  ;;  %v5035_v21 = vpack.c.bf16 %v480_v25, %v473_v40  ;;  %v500_v5 = vsub.f32 %v6313_v24, %v499_v37  ;;  %v507_v11 = vsub.f32 %v6316_v33, %v506_v42  ;;  %v6403_v40 = vld [vmem:[#allocation4] sm:$0xff] }
  0x6f   : > { %v487_v39 = vand.u32 4294901760, %v486_v62  ;;  %v494_v60 = vand.u32 4294901760, %v493_v7  ;;  %v514_v9 = vsub.f32 %v6322_v55, %v513_v43  ;;  %v521_v25 = vsub.f32 %v6324_v14, %v520_v44 }
  0x70   : > { %v508_v32 = vand.u32 4294901760, %v507_v11  ;;  %v535_v42 = vsub.f32 %v6331_v20, %v534_v53  ;;  %v549_v8 = vsub.f32 %v6336_v61, %v548_v1  ;;  %v5059_v53 = vpack.c.bf16 %v6214_v27, %v6212_v26  ;;  %v6407_v26 = vld [vmem:[#allocation4 + $0x10] sm:$0xff] }
  0x71   : > { %5022 = vmatpush3.bf16.msra.mxu0 %v6287_v0  ;;  %v5039_v30 = vpack.c.bf16 %v494_v60, %v487_v39  ;;  %v515_v37 = vand.u32 4294901760, %v514_v9  ;;  %v522_v47 = vand.u32 4294901760, %v521_v25  ;;  %v542_v60 = vsub.f32 %v6334_v22, %v541_v57 }
  0x72   : > { %5024 = vmatprep.subr.bf16.mxu0 %v6290_v3  ;;  %v536_v7 = vand.u32 4294901760, %v535_v42  ;;  %v5063_v57 = vpack.c.bf16 %v6253_v45, %v6236_v35  ;;  %v5067_v1 = vpack.c.bf16 %v6264_v50, %v6255_v46  ;;  %v1118_v27 = vand.u32 4294901760, %v6403_v40  ;;  %v6412_v45 = vld [vmem:[#allocation4 + $0x18] sm:$0xff] }
  0x73   : > { %v5047_v43 = vpack.c.bf16 %v522_v47, %v515_v37  ;;  %v543_v44 = vand.u32 4294901760, %v542_v60  ;;  %v5071_v46 = vpack.c.bf16 %v6310_v16, %v6305_v12  ;;  %v1127_v50 = vand.u32 4294901760, %v6412_v45  ;;  %v1107_v47 = vld [vmem:[#allocation4 + $0x70] sm:$0xff]  ;;  %v1108_v42 = vld [vmem:[#allocation4 + $0x78] sm:$0xff] }
  0x74   : > { %v5075_v12 = vpack.c.bf16 %v6316_v33, %v6313_v24  ;;  %v5079_v16 = vpack.c.bf16 %v6324_v14, %v6322_v55  ;;  %v5083_v11 = vpack.c.bf16 %v6331_v20, %v6329_v15  ;;  %v5087_v24 = vpack.c.bf16 %v6336_v61, %v6334_v22 }
  0x75   : > { %5026 = vmatpush3.bf16.msra.mxu0 %v6290_v3  ;;  %v7636_v33 = vand.u32 4294901760, %v6207_v23  ;;  %v7638_v55 = vand.u32 4294901760, %v6319_v38  ;;  %v7639_v14 = vand.u32 4294901760, %v6339_v31  ;;  %v7643_v20 = vld [vmem:[#allocation14_spill] sm:$0xff] }
  0x76   : > { %5028 = vmatprep.subr.bf16.mxu0 %v5027_v54 }
  0x78   : > { %4116 = vmatmul.mubr.f32.vlgmr.msra.gmra.mrb[0].mxu0 %v414_v29  ;;  %v501_v29 = vand.u32 4294901760, %v500_v5 }
  0x79   : > { %5030 = vmatpush3.bf16.msra.mxu0 %v5027_v54  ;;  %4118 = vmatprep.mubr.f32.mxu0 %v424_v49  ;;  %v528_v54 = vsub.f32 %v6329_v15, %v527_v52  ;;  %v550_v52 = vand.u32 4294901760, %v549_v8  ;;  %v6405_v49 = vld [vmem:[#allocation4 + $0x8] sm:$0xff] }
  0x7a   : > { %5032 = vmatprep.subr.bf16.mxu0 %v5031_v59  ;;  %v5043_v36 = vpack.c.bf16 %v508_v32, %v501_v29  ;;  %v1121_v35 = vand.u32 4294901760, %v6405_v49  ;;  %v7641_v15 = vld [vmem:[#allocation12_spill] sm:$0xff] }
  0x7b   : > { %v5055_v39 = vpack.c.bf16 %v550_v52, %v543_v44  ;;  %v1106_v29 = vld [vmem:[#allocation4 + $0x68] sm:$0xff] }
  0x7c   : > { %4119 = vmatmul.mubr.f32.gmra.mrb[2].mxu0 %v434_v51  ;;  %v529_v51 = vand.u32 4294901760, %v528_v54  ;;  %v6422_v62 = vpack.c.bf16 %v1121_v35, %v1118_v27  ;;  %v1157_v25 = vand.u32 4294901760, %v1106_v29  ;;  %v6535_v37 = vsub.f32 %v6405_v49, %v1121_v35 }
  0x7d   : > { %5034 = vmatpush3.bf16.msra.mxu0 %v5031_v59  ;;  %4153 = vmatprep.mubr.f32.mxu0 %v6189_v17  ;;  %v1124_v59 = vand.u32 4294901760, %v6407_v26 }
  0x7e   : > { %5036 = vmatprep.subr.bf16.mxu0 %v5035_v21  ;;  %5188 = vmatprep.subr.bf16.mxu1 %v6422_v62  ;;  %v1248_v60 = vand.u32 4294901760, %v6535_v37 }
  0x7f   : > { %v6428_v5 = vpack.c.bf16 %v1127_v50, %v1124_v59  ;;  %5190 = vmatpush3.bf16.msra.mxu1 %v6422_v62 }
  0x80   : > { %v1249_v44 = vsub.f32 %v6535_v37, %v1248_v60 }
  0x81   : > { %5038 = vmatpush3.bf16.msra.mxu0 %v5035_v21  ;;  %v5051_v21 = vpack.c.bf16 %v536_v7, %v529_v51  ;;  %5192 = vmatprep.subr.bf16.mxu1 %v6428_v5  ;;  %v1160_v51 = vand.u32 4294901760, %v1107_v47 }
  0x82   : > { %5040 = vmatprep.subr.bf16.mxu0 %v5039_v30 }
  0x83   : > { %5194 = vmatpush3.bf16.msra.mxu1 %v6428_v5 }
  0x85   : > { %5042 = vmatpush3.bf16.msra.mxu0 %v5039_v30  ;;  %v1105_v30 = vld [vmem:[#allocation4 + $0x60] sm:$0xff] }
  0x86   : > { %5044 = vmatprep.subr.bf16.mxu0 %v5043_v36  ;;  %v1154_v32 = vand.u32 4294901760, %v1105_v30 }
  0x88   : > { %v6525_v54 = vpack.c.bf16 %v1157_v25, %v1154_v32 }
  0x89   : > { %5046 = vmatpush3.bf16.msra.mxu0 %v5043_v36  ;;  %v6530_v36 = vsub.f32 %v6403_v40, %v1118_v27 }
  0x8a   : > { %5048 = vmatprep.subr.bf16.mxu0 %v5047_v43 }
  0x8b   : > { %v1241_v7 = vand.u32 4294901760, %v6530_v36 }
  0x8d   : > { %5050 = vmatpush3.bf16.msra.mxu0 %v5047_v43  ;;  %v1163_v43 = vand.u32 4294901760, %v1108_v42 }
  0x8e   : > { %5052 = vmatprep.subr.bf16.mxu0 %v5051_v21 }
  0x8f   : > { %v6541_v8 = vpack.c.bf16 %v1163_v43, %v1160_v51 }
  0x91   : > { %5054 = vmatpush3.bf16.msra.mxu0 %v5051_v21  ;;  %v1242_v21 = vsub.f32 %v6530_v36, %v1241_v7 }
  0x92   : > { %5056 = vmatprep.subr.bf16.mxu0 %v5055_v39 }
  0x93   : > { %v1243_v52 = vand.u32 4294901760, %v1242_v21 }
  0x95   : > { %5058 = vmatpush3.bf16.msra.mxu0 %v5055_v39  ;;  %v1250_v39 = vand.u32 4294901760, %v1249_v44 }
  0x96   : > { %5060 = vmatprep.subr.bf16.mxu0 %v5059_v53 }
  0x98   : > { %4154 = vmatmul.mubr.f32.vlgmr.msra.gmra.mrb[0].mxu0 %v6234_v34 }
  0x99   : > { %5062 = vmatpush3.bf16.msra.mxu0 %v5059_v53  ;;  %4156 = vmatprep.mubr.f32.mxu0 %v6294_v6  ;;  %v6551_v53 = vpack.c.bf16 %v1250_v39, %v1243_v52 }
  0x9a   : > { %5064 = vmatprep.subr.bf16.mxu0 %v5063_v57 }
  0x9c   : > { %4157 = vmatmul.mubr.f32.gmra.mrb[2].mxu0 %v6326_v19 }
  0x9d   : > { %5066 = vmatpush3.bf16.msra.mxu0 %v5063_v57  ;;  %4191 = vmatprep.mubr.f32.mxu0 %v6207_v23  ;;  %v7637_v23 = vand.u32 4294901760, %v6261_v48 }
  0x9e   : > { %5068 = vmatprep.subr.bf16.mxu0 %v5067_v1 }
  0xa1   : > { %5070 = vmatpush3.bf16.msra.mxu0 %v5067_v1 }
  0xa2   : > { %5072 = vmatprep.subr.bf16.mxu0 %v5071_v46 }
  0xa5   : > { %5074 = vmatpush3.bf16.msra.mxu0 %v5071_v46 }
  0xa6   : > { %5076 = vmatprep.subr.bf16.mxu0 %v5075_v12 }
  0xa9   : > { %5078 = vmatpush3.bf16.msra.mxu0 %v5075_v12 }
  0xaa   : > { %5080 = vmatprep.subr.bf16.mxu0 %v5079_v16 }
  0xad   : > { %5082 = vmatpush3.bf16.msra.mxu0 %v5079_v16 }
  0xae   : > { %5084 = vmatprep.subr.bf16.mxu0 %v5083_v11 }
  0xb1   : > { %5086 = vmatpush3.bf16.msra.mxu0 %v5083_v11 }
  0xb2   : > { %5088 = vmatprep.subr.bf16.mxu0 %v5087_v24 }
  0xb5   : > { %5090 = vmatpush3.bf16.msra.mxu0 %v5087_v24 }
  0xb6   : > { %5092 = vmatprep.subr.bf16.mxu0 %v6172_v10 }
  0xb8   : > { %4192 = vmatmul.mubr.f32.vlgmr.msra.gmra.mrb[0].mxu0 %v6261_v48  ;;  %v7640_v48 = vld [vmem:[#allocation11_spill] sm:$0xff] }
  0xb9   : > { %5094 = vmatpush3.bf16.msra.mxu0 %v6172_v10  ;;  %4194 = vmatprep.mubr.f32.mxu0 %v6319_v38  ;;  %v7642_v38 = vld [vmem:[#allocation13_spill] sm:$0xff] }
  0xba   : > { %5096 = vmatprep.subr.bf16.mxu0 %v6174_v13 }
  0xbc   : > { %4195 = vmatmul.mubr.f32.gmra.mrb[2].mxu0 %v6339_v31 }
  0xbd   : > { %5098 = vmatpush3.bf16.msra.mxu0 %v6174_v13  ;;  %4229 = vmatprep.mubr.f32.mxu0 %v7636_v33 }
  0xbe   : > { %5100 = vmatprep.subr.bf16.mxu0 %v6192_v18 }
  0xc1   : > { %5102 = vmatpush3.bf16.msra.mxu0 %v6192_v18 }
  0xc2   : > { %5104 = vmatprep.subr.bf16.mxu0 %v6221_v28 }
  0xc5   : > { %5106 = vmatpush3.bf16.msra.mxu0 %v6221_v28 }
  0xc6   : > { %5108 = vmatprep.subr.bf16.mxu0 %v6245_v41 }
  0xc9   : > { %5110 = vmatpush3.bf16.msra.mxu0 %v6245_v41 }
  0xca   : > { %5112 = vmatprep.subr.bf16.mxu0 %v6274_v56 }
  0xcd   : > { %5114 = vmatpush3.bf16.msra.mxu0 %v6274_v56 }
  0xce   : > { %5116 = vmatprep.subr.bf16.mxu0 %v6287_v0 }
  0xd1   : > { %5118 = vmatpush3.bf16.msra.mxu0 %v6287_v0 }
  0xd2   : > { %5120 = vmatprep.subr.bf16.mxu0 %v6290_v3 }
  0xd5   : > { %5122 = vmatpush3.bf16.msra.mxu0 %v6290_v3 }
  0xd6   : > { %5124 = vmatprep.subr.bf16.mxu0 %v6360_v63 }
  0xd8   : > { %4230 = vmatmul.mubr.f32.vlgmr.msra.gmra.mrb[0].mxu0 %v7637_v23 }
  0xd9   : > { %5126 = vmatpush3.bf16.msra.mxu0 %v6360_v63  ;;  %4232 = vmatprep.mubr.f32.mxu0 %v7638_v55  ;;  %v1103_v63 = vld [vmem:[#allocation4 + $0x50] sm:$0xff] }
  0xda   : > { %5128 = vmatprep.subr.bf16.mxu0 %v6365_v2 }
  0xdc   : > { %4233 = vmatmul.mubr.f32.gmra.mrb[2].mxu0 %v7639_v14 }
  0xdd   : > { %5130 = vmatpush3.bf16.msra.mxu0 %v6365_v2  ;;  %4267 = vmatprep.mubr.f32.mxu0 %v6189_v17  ;;  %v1104_v2 = vld [vmem:[#allocation4 + $0x58] sm:$0xff] }
  0xde   : > { %5132 = vmatprep.subr.bf16.mxu0 %v6367_v4 }
  0xe1   : > { %5134 = vmatpush3.bf16.msra.mxu0 %v6367_v4  ;;  %v1148_v4 = vand.u32 4294901760, %v1103_v63 }
  0xe2   : > { %5136 = vmatprep.subr.bf16.mxu0 %v7640_v48 }
  0xe5   : > { %5138 = vmatpush3.bf16.msra.mxu0 %v7640_v48 }
  0xe6   : > { %5140 = vmatprep.subr.bf16.mxu0 %v7641_v15 }
  0xe9   : > { %5142 = vmatpush3.bf16.msra.mxu0 %v7641_v15 }
  0xea   : > { %5144 = vmatprep.subr.bf16.mxu0 %v7642_v38 }
  0xed   : > { %5146 = vmatpush3.bf16.msra.mxu0 %v7642_v38 }
  0xee   : > { %5148 = vmatprep.subr.bf16.mxu0 %v7643_v20 }
  0xf1   : > { %5150 = vmatpush3.bf16.msra.mxu0 %v7643_v20 }
  0xf2   : > { %5152 = vmatprep.subr.bf16.mxu0 %v6381_v58 }
  0xf5   : > { %5154 = vmatpush3.bf16.msra.mxu0 %v6381_v58  ;;  %v1151_v58 = vand.u32 4294901760, %v1104_v2 }
  0xf6   : > { %5156 = vmatprep.subr.bf16.mxu0 %v6172_v10 }
  0xf7   : > { %v6521_v9 = vpack.c.bf16 %v1151_v58, %v1148_v4 }
  0xf8   : > { %4268 = vmatmul.mubr.f32.vlgmr.msra.gmra.mrb[0].mxu0 %v6234_v34 }
  0xf9   : > { %5158 = vmatpush3.bf16.msra.mxu0 %v6172_v10  ;;  %4270 = vmatprep.mubr.f32.mxu0 %v6294_v6  ;;  %v1097_v10 = vld [vmem:[#allocation4 + $0x20] sm:$0xff] }
  0xfa   : > { %5160 = vmatprep.subr.bf16.mxu0 %v6174_v13 }
  0xfc   : > { %4271 = vmatmul.mubr.f32.gmra.mrb[2].mxu0 %v6326_v19 }
  0xfd   : > { %5162 = vmatpush3.bf16.msra.mxu0 %v6174_v13  ;;  %4305 = vmatprep.mubr.f32.mxu0 %v6189_v17  ;;  %v1098_v13 = vld [vmem:[#allocation4 + $0x28] sm:$0xff]  ;;  %v1130_v17 = vand.u32 4294901760, %v1097_v10 }
  0xfe   : > { %5164 = vmatprep.subr.bf16.mxu0 %v6192_v18 }
  0xff   : > { %v6553_v57 = vsub.f32 %v1097_v10, %v1130_v17 }
 0x101   : > { %5166 = vmatpush3.bf16.msra.mxu0 %v6192_v18  ;;  %v1133_v18 = vand.u32 4294901760, %v1098_v13  ;;  %v7599_v40 = vand.u32 4294901760, %v6553_v57 }
 0x102   : > { %5168 = vmatprep.subr.bf16.mxu0 %v6221_v28 }
 0x103   : > { %v6555_v1 = vsub.f32 %v1098_v13, %v1133_v18  ;;  %v1270_v27 = vsub.f32 %v6553_v57, %v7599_v40 }
 0x105   : > { %5170 = vmatpush3.bf16.msra.mxu0 %v6221_v28  ;;  %v6509_v28 = vpack.c.bf16 %v1133_v18, %v1130_v17  ;;  %v7598_v49 = vand.u32 4294901760, %v6555_v1  ;;  %v1271_v16 = vand.u32 4294901760, %v1270_v27 }
 0x106   : > { %5172 = vmatprep.subr.bf16.mxu0 %v6245_v41 }
 0x107   : > { %5196 = vmatprep.subr.bf16.mxu1 %v6509_v28  ;;  %v1277_v35 = vsub.f32 %v6555_v1, %v7598_v49 }
 0x108   : > { %5198 = vmatpush3.bf16.msra.mxu1 %v6509_v28 }
 0x109   : > { %5174 = vmatpush3.bf16.msra.mxu0 %v6245_v41  ;;  %v1099_v41 = vld [vmem:[#allocation4 + $0x30] sm:$0xff]  ;;  %v1278_v11 = vand.u32 4294901760, %v1277_v35 }
 0x10a   : > { %5176 = vmatprep.subr.bf16.mxu0 %v6274_v56 }
 0x10b   : > { %v6572_v23 = vpack.c.bf16 %v1278_v11, %v1271_v16  ;;  %v6619_v16 = vsub.f32 %v1107_v47, %v1160_v51  ;;  %v6621_v11 = vsub.f32 %v1108_v42, %v1163_v43 }
 0x10d   : > { %5178 = vmatpush3.bf16.msra.mxu0 %v6274_v56  ;;  %v1100_v56 = vld [vmem:[#allocation4 + $0x38] sm:$0xff] }
 0x10e   : > { %5180 = vmatprep.subr.bf16.mxu0 %v6287_v0  ;;  %v1139_v22 = vand.u32 4294901760, %v1100_v56 }
 0x110   : > { %v6568_v12 = vsub.f32 %v1100_v56, %v1139_v22  ;;  %v6594_v56 = vsub.f32 %v1104_v2, %v1151_v58  ;;  %v6608_v2 = vsub.f32 %v1105_v30, %v1154_v32  ;;  %v7589_v32 = vand.u32 4294901760, %v6619_v16 }
 0x111   : > { %5182 = vmatpush3.bf16.msra.mxu0 %v6287_v0  ;;  %v1136_v0 = vand.u32 4294901760, %v1099_v41 }
 0x112   : > { %5184 = vmatprep.subr.bf16.mxu0 %v6290_v3  ;;  %v7596_v33 = vand.u32 4294901760, %v6568_v12  ;;  %v7591_v52 = vand.u32 4294901760, %v6608_v2 }
 0x113   : > { %v6566_v46 = vsub.f32 %v1099_v41, %v1136_v0  ;;  %v6592_v41 = vsub.f32 %v1103_v63, %v1148_v4  ;;  %v6610_v4 = vsub.f32 %v1106_v29, %v1157_v25  ;;  %v7588_v25 = vand.u32 4294901760, %v6621_v11 }
 0x114   : > { %v1291_v15 = vsub.f32 %v6568_v12, %v7596_v33  ;;  %v1326_v35 = vsub.f32 %v6608_v2, %v7591_v52 }
 0x115   : > { %5186 = vmatpush3.bf16.msra.mxu0 %v6290_v3  ;;  %v6513_v3 = vpack.c.bf16 %v1139_v22, %v1136_v0  ;;  %v7597_v24 = vand.u32 4294901760, %v6566_v46  ;;  %v7590_v39 = vand.u32 4294901760, %v6610_v4  ;;  %v1347_v47 = vsub.f32 %v6621_v11, %v7588_v25 }
 0x116   : > { %v1292_v13 = vand.u32 4294901760, %v1291_v15  ;;  %v1327_v29 = vand.u32 4294901760, %v1326_v35  ;;  %v1340_v15 = vsub.f32 %v6619_v16, %v7589_v32  ;;  %v6677_v25 = vsub.f32 %v6412_v45, %v1127_v50 }
 0x117   : > { %5200 = vmatprep.subr.bf16.mxu1 %v6513_v3  ;;  %v1284_v55 = vsub.f32 %v6566_v46, %v7597_v24  ;;  %v1333_v30 = vsub.f32 %v6610_v4, %v7590_v39  ;;  %v1348_v43 = vand.u32 4294901760, %v1347_v47 }
 0x118   : > { %4306 = vmatmul.mubr.f32.vlgmr.msra.gmra.mrb[0].mxu0 %v6234_v34  ;;  %v1101_v34 = vld [vmem:[#allocation4 + $0x40] sm:$0xff]  ;;  %5202 = vmatpush3.bf16.msra.mxu1 %v6513_v3  ;;  %v1341_v51 = vand.u32 4294901760, %v1340_v15 }
 0x119   : > { %4308 = vmatprep.mubr.f32.mxu0 %v6294_v6  ;;  %v1102_v6 = vld [vmem:[#allocation4 + $0x48] sm:$0xff]  ;;  %v1285_v38 = vand.u32 4294901760, %v1284_v55  ;;  %v1334_v55 = vand.u32 4294901760, %v1333_v30 }
 0x11a   : > { %v1145_v61 = vand.u32 4294901760, %v1102_v6 }
 0x11b   : > { %v6596_v0 = vpack.c.bf16 %v1292_v13, %v1285_v38  ;;  %v6634_v42 = vpack.c.bf16 %v1334_v55, %v1327_v29  ;;  %v6636_v38 = vpack.c.bf16 %v1348_v43, %v1341_v51  ;;  %v6640_v13 = vpack.c.bf16 %v6535_v37, %v6530_v36 }
 0x11c   : > { %4309 = vmatmul.mubr.f32.gmra.mrb[2].mxu0 %v6326_v19  ;;  %v1142_v19 = vand.u32 4294901760, %v1101_v34  ;;  %v6579_v48 = vsub.f32 %v1102_v6, %v1145_v61  ;;  %v7593_v6 = vand.u32 4294901760, %v6592_v41  ;;  %v6672_v43 = vsub.f32 %v6407_v26, %v1124_v59 }
 0x11d   : > { %v7645_v36 = vand.u32 4294901760, %v6553_v57  ;;  %v7646_v37 = vand.u32 4294901760, %v6555_v1 }
 0x11e   : > { %v6517_v31 = vpack.c.bf16 %v1145_v61, %v1142_v19  ;;  %v6577_v14 = vsub.f32 %v1101_v34, %v1142_v19  ;;  %v7594_v10 = vand.u32 4294901760, %v6579_v48  ;;  %v7592_v19 = vand.u32 4294901760, %v6594_v56 }
 0x11f   : > { %v1312_v21 = vsub.f32 %v6592_v41, %v7593_v6 }
 0x120   : > { %5204 = vmatprep.subr.bf16.mxu1 %v6517_v31  ;;  %v7595_v20 = vand.u32 4294901760, %v6577_v14  ;;  %v1305_v18 = vsub.f32 %v6579_v48, %v7594_v10  ;;  %v1319_v63 = vsub.f32 %v6594_v56, %v7592_v19 }
 0x121   : > { %5206 = vmatpush3.bf16.msra.mxu1 %v6517_v31  ;;  %v1313_v58 = vand.u32 4294901760, %v1312_v21  ;;  %v6660_v21 = vpack.c.bf16 %v6610_v4, %v6608_v2 }
 0x122   : > { %5208 = vmatprep.subr.bf16.mxu1 %v6521_v9  ;;  %v1298_v17 = vsub.f32 %v6577_v14, %v7595_v20  ;;  %v1306_v34 = vand.u32 4294901760, %v1305_v18  ;;  %v1320_v44 = vand.u32 4294901760, %v1319_v63  ;;  %v6648_v18 = vpack.c.bf16 %v6568_v12, %v6566_v46 }
 0x123   : > { %v6664_v63 = vpack.c.bf16 %v6621_v11, %v6619_v16 }
 0x124   : > { %v1299_v22 = vand.u32 4294901760, %v1298_v17  ;;  %v6614_v27 = vpack.c.bf16 %v1320_v44, %v1313_v58  ;;  %v6644_v17 = vpack.c.bf16 %v6555_v1, %v6553_v57  ;;  %v3594_v58 = vld [vmem:[%s7572_s3] ss:$0 sm:$0xff]  ;;  %v7650_v57 = vand.u32 4294901760, %v6579_v48 }
 0x125   : > { %5210 = vmatpush3.bf16.msra.mxu1 %v6521_v9 }
 0x126   : > { %5212 = vmatprep.subr.bf16.mxu1 %v6525_v54  ;;  %v6600_v61 = vpack.c.bf16 %v1306_v34, %v1299_v22  ;;  %v6652_v22 = vpack.c.bf16 %v6579_v48, %v6577_v14  ;;  %v6656_v34 = vpack.c.bf16 %v6594_v56, %v6592_v41  ;;  %v7656_v48 = vand.u32 4294901760, %v6621_v11 }
 0x129   : > { %5214 = vmatpush3.bf16.msra.mxu1 %v6525_v54 }
 0x12a   : > { %5216 = vmatprep.subr.bf16.mxu1 %v6541_v8 }
 0x12d   : > { %5218 = vmatpush3.bf16.msra.mxu1 %v6541_v8 }
 0x12e   : > { %5220 = vmatprep.subr.bf16.mxu1 %v6551_v53 }
 0x1eb   : > { %v4307_v44 = vpop.f32.mrb[0].mxu0 }
 0x1ec   : > { %v5763_v35 = vadd.f32 %v4307_v44, %v3594_v58  ;;  %v1067_v30 = vpop.f32.mrb[1].mxu0  ;;  %v1255_v44 = vand.u32 4294901760, %v6672_v43 }
 0x1ed   : > { %v5764_v29 = vadd.f32 %v3594_v58, %v1067_v30 }
 0x1ee   : > { %5891 = vtanh.f32 %v5763_v35  ;;  %v7600_v35 = vand.u32 4294901760, %v6677_v25  ;;  %v1256_v26 = vsub.f32 %v6672_v43, %v1255_v44 }
 0x1ef   : > { %5893 = vtanh.f32 %v5764_v29  ;;  %v4310_v55 = vpop.f32.mrb[2].mxu0 }
 0x1f0   : > { %v5765_v15 = vadd.f32 %v4310_v55, %v3594_v58  ;;  %v1079_v47 = vpop.f32.mrb[3].mxu0  ;;  %v1263_v45 = vsub.f32 %v6677_v25, %v7600_v35  ;;  %v1257_v19 = vand.u32 4294901760, %v1256_v26 }
 0x1f1   : > { %v5766_v51 = vadd.f32 %v3594_v58, %v1079_v47 }
 0x1f2   : > { %5895 = vtanh.f32 %v5765_v15  ;;  %v1264_v6 = vand.u32 4294901760, %v1263_v45 }
 0x1f3   : > { %5897 = vtanh.f32 %v5766_v51 }
 0x1f4   : > { %v5223_v35 = vpack.c.bf16 %v1264_v6, %v1257_v19  ;;  %v6753_v19 = vld [vmem:[#allocation4 + $0x98] sm:$0xff] }
 0x1f8   : > { %v5892_v30 = vpop.eup %5891 }
 0x1f9   : > { %v5894_v29 = vpop.eup %5893  ;;  %v6681_v55 = vand.u32 4294901760, %v5892_v30 }
 0x1fa   : > { %v6683_v58 = vand.u32 4294901760, %v5894_v29 }
 0x1fb   : > { %v6686_v15 = vsub.f32 %v5892_v30, %v6681_v55 }
 0x1fc   : > { %v5896_v59 = vpop.eup %5895  ;;  %v6695_v50 = vsub.f32 %v5894_v29, %v6683_v58 }
 0x1fd   : > { %v5898_v47 = vpop.eup %5897  ;;  %v6697_v51 = vand.u32 4294901760, %v5896_v59  ;;  %v1210_v32 = vand.u32 4294901760, %v6686_v15 }
 0x1fe   : > { %v6700_v39 = vand.u32 4294901760, %v5898_v47  ;;  %v1200_v30 = vand.u32 4294901760, %v6695_v50 }
 0x1ff   : > { %v1211_v52 = vsub.f32 %v6686_v15, %v1210_v32  ;;  %v6707_v10 = vsub.f32 %v5896_v59, %v6697_v51 }
 0x200   : > { %v1201_v29 = vsub.f32 %v6695_v50, %v1200_v30  ;;  %v6713_v20 = vsub.f32 %v5898_v47, %v6700_v39 }
 0x201   : > { %v1230_v33 = vand.u32 4294901760, %v6707_v10  ;;  %v1212_v40 = vand.u32 4294901760, %v1211_v52  ;;  %v1926_v52 = vand.u32 4294901760, %v6753_v19 }
 0x202   : > { %v1202_v24 = vand.u32 4294901760, %v1201_v29  ;;  %v1220_v49 = vand.u32 4294901760, %v6713_v20  ;;  %v1906_v29 = vld [vmem:[#allocation4 + $0xf0] sm:$0xff] }
 0x203   : > { %v1231_v26 = vsub.f32 %v6707_v10, %v1230_v33 }
 0x204   : > { %4343 = vmatprep.mubr.f32.mxu1 %v1202_v24  ;;  %v1221_v45 = vsub.f32 %v6713_v20, %v1220_v49  ;;  %v6746_v24 = vld [vmem:[#allocation4 + $0x88] sm:$0xff] }
 0x205   : > { %4344 = vmatmul.mubr.f32.vlgmr.msra.gmra.mrb[0].mxu1 %v1212_v40  ;;  %v1232_v47 = vand.u32 4294901760, %v1231_v26  ;;  %v6744_v40 = vld [vmem:[#allocation4 + $0x80] sm:$0xff]  ;;  %v1920_v6 = vand.u32 4294901760, %v6746_v24  ;;  %v1907_v26 = vld [vmem:[#allocation4 + $0xf8] sm:$0xff] }
 0x206   : > { %5222 = vmatpush3.bf16.msra.mxu1 %v6551_v53  ;;  %v1222_v59 = vand.u32 4294901760, %v1221_v45  ;;  %v5255_v53 = vpack.c.bf16 %v6677_v25, %v6672_v43  ;;  %v1959_v45 = vand.u32 4294901760, %v1906_v29 }
 0x207   : > { %5224 = vmatprep.subr.bf16.mxu1 %v5223_v35 }
 0x208   : > { %4346 = vmatprep.mubr.f32.mxu1 %v1222_v59  ;;  %v1962_v59 = vand.u32 4294901760, %v1907_v26 }
 0x209   : > { %4347 = vmatmul.mubr.f32.gmra.mrb[2].mxu1 %v1232_v47 }
 0x20a   : > { %5226 = vmatpush3.bf16.msra.mxu1 %v5223_v35  ;;  %4381 = vmatprep.mubr.f32.mxu1 %v6683_v58  ;;  %v1904_v35 = vld [vmem:[#allocation4 + $0xe0] sm:$0xff] }
 0x20b   : > { %5228 = vmatprep.subr.bf16.mxu1 %v6572_v23 }
 0x20e   : > { %5230 = vmatpush3.bf16.msra.mxu1 %v6572_v23  ;;  %v6748_v23 = vld [vmem:[#allocation4 + $0x90] sm:$0xff] }
 0x20f   : > { %5232 = vmatprep.subr.bf16.mxu1 %v6596_v0 }
 0x212   : > { %5234 = vmatpush3.bf16.msra.mxu1 %v6596_v0  ;;  %v1917_v0 = vand.u32 4294901760, %v6744_v40 }
 0x213   : > { %5236 = vmatprep.subr.bf16.mxu1 %v6600_v61 }
 0x216   : > { %5238 = vmatpush3.bf16.msra.mxu1 %v6600_v61  ;;  %v1923_v61 = vand.u32 4294901760, %v6748_v23 }
 0x217   : > { %5240 = vmatprep.subr.bf16.mxu1 %v6614_v27 }
 0x21a   : > { %5242 = vmatpush3.bf16.msra.mxu1 %v6614_v27  ;;  %v6762_v27 = vpack.c.bf16 %v1920_v6, %v1917_v0 }
 0x21b   : > { %5244 = vmatprep.subr.bf16.mxu1 %v6634_v42 }
 0x21c   : > { %5380 = vmatprep.subr.bf16.mxu0 %v6762_v27 }
 0x21d   : > { %5382 = vmatpush3.bf16.msra.mxu0 %v6762_v27 }
 0x21e   : > { %5246 = vmatpush3.bf16.msra.mxu1 %v6634_v42  ;;  %v6768_v42 = vpack.c.bf16 %v1926_v52, %v1923_v61 }
 0x21f   : > { %5248 = vmatprep.subr.bf16.mxu1 %v6636_v38 }
 0x220   : > { %5384 = vmatprep.subr.bf16.mxu0 %v6768_v42 }
 0x221   : > { %5386 = vmatpush3.bf16.msra.mxu0 %v6768_v42 }
 0x222   : > { %5250 = vmatpush3.bf16.msra.mxu1 %v6636_v38  ;;  %v5315_v38 = vpack.c.bf16 %v1248_v60, %v1241_v7  ;;  %v5323_v7 = vpack.c.bf16 %v7646_v37, %v7645_v36  ;;  %v7647_v60 = vand.u32 4294901760, %v6566_v46  ;;  %v7653_v46 = vand.u32 4294901760, %v6608_v2  ;;  %v1900_v2 = vld [vmem:[#allocation4 + $0xc0] sm:$0xff] }
 0x223   : > { %5252 = vmatprep.subr.bf16.mxu1 %v6640_v13 }
 0x225   : > { %4382 = vmatmul.mubr.f32.vlgmr.msra.gmra.mrb[0].mxu1 %v6681_v55 }
 0x226   : > { %4384 = vmatprep.mubr.f32.mxu1 %v6700_v39  ;;  %5254 = vmatpush3.bf16.msra.mxu1 %v6640_v13  ;;  %v7644_v13 = vand.u32 4294901760, %v6677_v25 }
 0x227   : > { %5256 = vmatprep.subr.bf16.mxu1 %v5255_v53 }
 0x229   : > { %4385 = vmatmul.mubr.f32.gmra.mrb[2].mxu1 %v6697_v51 }
 0x22a   : > { %5258 = vmatpush3.bf16.msra.mxu1 %v5255_v53  ;;  %4419 = vmatprep.mubr.f32.mxu1 %v6695_v50 }
 0x22b   : > { %5260 = vmatprep.subr.bf16.mxu1 %v6644_v17 }
 0x22e   : > { %5262 = vmatpush3.bf16.msra.mxu1 %v6644_v17  ;;  %v5319_v17 = vpack.c.bf16 %v7644_v13, %v1255_v44 }
 0x22f   : > { %5264 = vmatprep.subr.bf16.mxu1 %v6648_v18 }
 0x232   : > { %5266 = vmatpush3.bf16.msra.mxu1 %v6648_v18 }
 0x233   : > { %5268 = vmatprep.subr.bf16.mxu1 %v6652_v22 }
 0x236   : > { %5270 = vmatpush3.bf16.msra.mxu1 %v6652_v22 }
 0x237   : > { %5272 = vmatprep.subr.bf16.mxu1 %v6656_v34 }
 0x23a   : > { %5274 = vmatpush3.bf16.msra.mxu1 %v6656_v34  ;;  %v1902_v34 = vld [vmem:[#allocation4 + $0xd0] sm:$0xff] }
 0x23b   : > { %5276 = vmatprep.subr.bf16.mxu1 %v6660_v21 }
 0x23e   : > { %5278 = vmatpush3.bf16.msra.mxu1 %v6660_v21  ;;  %v1903_v21 = vld [vmem:[#allocation4 + $0xd8] sm:$0xff] }
 0x23f   : > { %5280 = vmatprep.subr.bf16.mxu1 %v6664_v63  ;;  %v1950_v43 = vand.u32 4294901760, %v1903_v21 }
 0x242   : > { %5282 = vmatpush3.bf16.msra.mxu1 %v6664_v63  ;;  %v1947_v63 = vand.u32 4294901760, %v1902_v34 }
 0x243   : > { %5284 = vmatprep.subr.bf16.mxu1 %v6422_v62 }
 0x244   : > { %v6880_v44 = vpack.c.bf16 %v1950_v43, %v1947_v63 }
 0x245   : > { %4420 = vmatmul.mubr.f32.vlgmr.msra.gmra.mrb[0].mxu1 %v6686_v15 }
 0x246   : > { %4422 = vmatprep.mubr.f32.mxu1 %v6713_v20  ;;  %5286 = vmatpush3.bf16.msra.mxu1 %v6422_v62 }
 0x247   : > { %5288 = vmatprep.subr.bf16.mxu1 %v6428_v5 }
 0x249   : > { %4423 = vmatmul.mubr.f32.gmra.mrb[2].mxu1 %v6707_v10  ;;  %v7652_v10 = vand.u32 4294901760, %v6594_v56 }
 0x24a   : > { %5290 = vmatpush3.bf16.msra.mxu1 %v6428_v5  ;;  %4457 = vmatprep.mubr.f32.mxu1 %v1200_v30  ;;  %v6894_v30 = vsub.f32 %v6746_v24, %v1920_v6 }
 0x24b   : > { %5292 = vmatprep.subr.bf16.mxu1 %v6509_v28 }
 0x24c   : > { %v2047_v53 = vand.u32 4294901760, %v6894_v30 }
 0x24e   : > { %5294 = vmatpush3.bf16.msra.mxu1 %v6509_v28  ;;  %v2048_v24 = vsub.f32 %v6894_v30, %v2047_v53 }
 0x24f   : > { %5296 = vmatprep.subr.bf16.mxu1 %v6513_v3 }
 0x250   : > { %v2049_v6 = vand.u32 4294901760, %v2048_v24 }
 0x252   : > { %5298 = vmatpush3.bf16.msra.mxu1 %v6513_v3 }
 0x253   : > { %5300 = vmatprep.subr.bf16.mxu1 %v6517_v31 }
 0x256   : > { %5302 = vmatpush3.bf16.msra.mxu1 %v6517_v31 }
 0x257   : > { %5304 = vmatprep.subr.bf16.mxu1 %v6521_v9 }
 0x25a   : > { %5306 = vmatpush3.bf16.msra.mxu1 %v6521_v9 }
 0x25b   : > { %5308 = vmatprep.subr.bf16.mxu1 %v6525_v54 }
 0x25e   : > { %5310 = vmatpush3.bf16.msra.mxu1 %v6525_v54 }
 0x25f   : > { %5312 = vmatprep.subr.bf16.mxu1 %v6541_v8 }
 0x262   : > { %5314 = vmatpush3.bf16.msra.mxu1 %v6541_v8 }
 0x263   : > { %5316 = vmatprep.subr.bf16.mxu1 %v5315_v38 }
 0x265   : > { %4458 = vmatmul.mubr.f32.vlgmr.msra.gmra.mrb[0].mxu1 %v1210_v32  ;;  %v7648_v32 = vand.u32 4294901760, %v6568_v12  ;;  %v7654_v12 = vand.u32 4294901760, %v6610_v4  ;;  %v1901_v4 = vld [vmem:[#allocation4 + $0xc8] sm:$0xff] }
 0x266   : > { %4460 = vmatprep.mubr.f32.mxu1 %v1220_v49  ;;  %5318 = vmatpush3.bf16.msra.mxu1 %v5315_v38  ;;  %v7649_v49 = vand.u32 4294901760, %v6577_v14  ;;  %v7655_v14 = vand.u32 4294901760, %v6619_v16  ;;  %v1944_v16 = vand.u32 4294901760, %v1901_v4  ;;  %v6900_v38 = vpack.c.bf16 %v1962_v59, %v1959_v45 }
 0x267   : > { %5320 = vmatprep.subr.bf16.mxu1 %v5319_v17  ;;  %v5327_v20 = vpack.c.bf16 %v7648_v32, %v7647_v60  ;;  %v5339_v18 = vpack.c.bf16 %v7654_v12, %v7653_v46 }
 0x268   : > { %v5331_v1 = vpack.c.bf16 %v7650_v57, %v7649_v49  ;;  %v5343_v22 = vpack.c.bf16 %v7656_v48, %v7655_v14 }
 0x269   : > { %4461 = vmatmul.mubr.f32.gmra.mrb[2].mxu1 %v1230_v33  ;;  %v7651_v33 = vand.u32 4294901760, %v6592_v41  ;;  %v1899_v41 = vld [vmem:[#allocation4 + $0xb8] sm:$0xff] }
 0x26a   : > { %5322 = vmatpush3.bf16.msra.mxu1 %v5319_v17  ;;  %4495 = vmatprep.mubr.f32.mxu1 %v6683_v58  ;;  %v1938_v56 = vand.u32 4294901760, %v1899_v41 }
 0x26b   : > { %5324 = vmatprep.subr.bf16.mxu1 %v5323_v7  ;;  %v5335_v25 = vpack.c.bf16 %v7652_v10, %v7651_v33 }
 0x26c   : > { %v6927_v49 = vsub.f32 %v1899_v41, %v1938_v56  ;;  %v6953_v41 = vsub.f32 %v1903_v21, %v1950_v43 }
 0x26e   : > { %5326 = vmatpush3.bf16.msra.mxu1 %v5323_v7  ;;  %v7609_v10 = vand.u32 4294901760, %v6927_v49 }
 0x26f   : > { %5328 = vmatprep.subr.bf16.mxu1 %v5327_v20 }
 0x270   : > { %v2090_v14 = vsub.f32 %v6927_v49, %v7609_v10 }
 0x272   : > { %5330 = vmatpush3.bf16.msra.mxu1 %v5327_v20 }
 0x273   : > { %5332 = vmatprep.subr.bf16.mxu1 %v5331_v1 }
 0x276   : > { %5334 = vmatpush3.bf16.msra.mxu1 %v5331_v1 }
 0x277   : > { %5336 = vmatprep.subr.bf16.mxu1 %v5335_v25 }
 0x27a   : > { %5338 = vmatpush3.bf16.msra.mxu1 %v5335_v25 }
 0x27b   : > { %5340 = vmatprep.subr.bf16.mxu1 %v5339_v18 }
 0x27e   : > { %5342 = vmatpush3.bf16.msra.mxu1 %v5339_v18  ;;  %v6938_v18 = vsub.f32 %v1901_v4, %v1944_v16 }
 0x27f   : > { %5344 = vmatprep.subr.bf16.mxu1 %v5343_v22 }
 0x282   : > { %5346 = vmatpush3.bf16.msra.mxu1 %v5343_v22 }
 0x283   : > { %5348 = vmatprep.subr.bf16.mxu1 %v6422_v62 }
 0x285   : > { %4496 = vmatmul.mubr.f32.vlgmr.msra.gmra.mrb[0].mxu1 %v6681_v55 }
 0x286   : > { %4498 = vmatprep.mubr.f32.mxu1 %v6700_v39  ;;  %5350 = vmatpush3.bf16.msra.mxu1 %v6422_v62  ;;  %v1896_v62 = vld [vmem:[#allocation4 + $0xa0] sm:$0xff] }
 0x287   : > { %5352 = vmatprep.subr.bf16.mxu1 %v6428_v5 }
 0x289   : > { %4499 = vmatmul.mubr.f32.gmra.mrb[2].mxu1 %v6697_v51 }
 0x28a   : > { %5354 = vmatpush3.bf16.msra.mxu1 %v6428_v5  ;;  %4533 = vmatprep.mubr.f32.mxu1 %v6683_v58  ;;  %v1897_v5 = vld [vmem:[#allocation4 + $0xa8] sm:$0xff]  ;;  %v1953_v58 = vand.u32 4294901760, %v1904_v35 }
 0x28b   : > { %5356 = vmatprep.subr.bf16.mxu1 %v6509_v28 }
 0x28c   : > { %v6967_v21 = vsub.f32 %v1904_v35, %v1953_v58 }
 0x28e   : > { %5358 = vmatpush3.bf16.msra.mxu1 %v6509_v28  ;;  %v1929_v28 = vand.u32 4294901760, %v1896_v62 }
 0x28f   : > { %5360 = vmatprep.subr.bf16.mxu1 %v6513_v3 }
 0x290   : > { %v6912_v17 = vsub.f32 %v1896_v62, %v1929_v28  ;;  %v7607_v62 = vand.u32 4294901760, %v6938_v18 }
 0x292   : > { %5362 = vmatpush3.bf16.msra.mxu1 %v6513_v3  ;;  %v1932_v3 = vand.u32 4294901760, %v1897_v5  ;;  %v7612_v37 = vand.u32 4294901760, %v6912_v17 }
 0x293   : > { %5364 = vmatprep.subr.bf16.mxu1 %v6517_v31 }
 0x294   : > { %v6914_v36 = vsub.f32 %v1897_v5, %v1932_v3  ;;  %v2069_v60 = vsub.f32 %v6912_v17, %v7612_v37  ;;  %v2091_v5 = vand.u32 4294901760, %v2090_v14 }
 0x296   : > { %5366 = vmatpush3.bf16.msra.mxu1 %v6517_v31  ;;  %v6868_v31 = vpack.c.bf16 %v1932_v3, %v1929_v28  ;;  %v7611_v7 = vand.u32 4294901760, %v6914_v36  ;;  %v2070_v57 = vand.u32 4294901760, %v2069_v60  ;;  %v2104_v3 = vsub.f32 %v6938_v18, %v7607_v62 }
 0x297   : > { %5368 = vmatprep.subr.bf16.mxu1 %v6521_v9 }
 0x298   : > { %5388 = vmatprep.subr.bf16.mxu0 %v6868_v31  ;;  %v2076_v32 = vsub.f32 %v6914_v36, %v7611_v7 }
 0x299   : > { %5390 = vmatpush3.bf16.msra.mxu0 %v6868_v31 }
 0x29a   : > { %5370 = vmatpush3.bf16.msra.mxu1 %v6521_v9  ;;  %v1898_v9 = vld [vmem:[#allocation4 + $0xb0] sm:$0xff]  ;;  %v2077_v1 = vand.u32 4294901760, %v2076_v32 }
 0x29b   : > { %5372 = vmatprep.subr.bf16.mxu1 %v6525_v54 }
 0x29c   : > { %v6931_v25 = vpack.c.bf16 %v2077_v1, %v2070_v57  ;;  %v6978_v57 = vsub.f32 %v1906_v29, %v1959_v45  ;;  %v6980_v1 = vsub.f32 %v1907_v26, %v1962_v59 }
 0x29e   : > { %5374 = vmatpush3.bf16.msra.mxu1 %v6525_v54  ;;  %v1935_v54 = vand.u32 4294901760, %v1898_v9 }
 0x29f   : > { %5376 = vmatprep.subr.bf16.mxu1 %v6541_v8 }
 0x2a0   : > { %v6925_v20 = vsub.f32 %v1898_v9, %v1935_v54  ;;  %v6951_v9 = vsub.f32 %v1902_v34, %v1947_v63 }
 0x2a2   : > { %5378 = vmatpush3.bf16.msra.mxu1 %v6541_v8  ;;  %v6872_v8 = vpack.c.bf16 %v1938_v56, %v1935_v54  ;;  %v7610_v33 = vand.u32 4294901760, %v6925_v20  ;;  %v7606_v4 = vand.u32 4294901760, %v6951_v9 }
 0x2a4   : > { %5392 = vmatprep.subr.bf16.mxu0 %v6872_v8  ;;  %v2083_v46 = vsub.f32 %v6925_v20, %v7610_v33 }
 0x2a5   : > { %4534 = vmatmul.mubr.f32.vlgmr.msra.gmra.mrb[0].mxu1 %v6681_v55  ;;  %5394 = vmatpush3.bf16.msra.mxu0 %v6872_v8  ;;  %v1905_v55 = vld [vmem:[#allocation4 + $0xe8] sm:$0xff] }
 0x2a6   : > { %4536 = vmatprep.mubr.f32.mxu1 %v6700_v39  ;;  %v1941_v39 = vand.u32 4294901760, %v1900_v2  ;;  %v1956_v15 = vand.u32 4294901760, %v1905_v55  ;;  %v2084_v48 = vand.u32 4294901760, %v2083_v46 }
 0x2a8   : > { %v6876_v11 = vpack.c.bf16 %v1944_v16, %v1941_v39  ;;  %v6884_v50 = vpack.c.bf16 %v1956_v15, %v1953_v58  ;;  %v6936_v12 = vsub.f32 %v1900_v2, %v1941_v39  ;;  %v6955_v54 = vpack.c.bf16 %v2091_v5, %v2084_v48 }
 0x2a9   : > { %4537 = vmatmul.mubr.f32.gmra.mrb[2].mxu1 %v6697_v51  ;;  %v6889_v51 = vsub.f32 %v6744_v40, %v1917_v0  ;;  %v2105_v2 = vand.u32 4294901760, %v2104_v3  ;;  %v7605_v39 = vand.u32 4294901760, %v6953_v41  ;;  %v6969_v63 = vsub.f32 %v1905_v55, %v1956_v15 }
 0x2aa   : > { %5396 = vmatprep.subr.bf16.mxu0 %v6876_v11  ;;  %v7608_v22 = vand.u32 4294901760, %v6936_v12  ;;  %v7602_v58 = vand.u32 4294901760, %v6978_v57  ;;  %v7601_v15 = vand.u32 4294901760, %v6980_v1  ;;  %v7007_v3 = vpack.c.bf16 %v6927_v49, %v6925_v20 }
 0x2ab   : > { %5398 = vmatpush3.bf16.msra.mxu0 %v6876_v11  ;;  %v2040_v47 = vand.u32 4294901760, %v6889_v51  ;;  %v2118_v34 = vsub.f32 %v6953_v41, %v7605_v39  ;;  %v6999_v5 = vpack.c.bf16 %v6894_v30, %v6889_v51  ;;  %v7659_v30 = vand.u32 4294901760, %v6914_v36 }
 0x2ac   : > { %5400 = vmatprep.subr.bf16.mxu0 %v6880_v44  ;;  %v2097_v28 = vsub.f32 %v6936_v12, %v7608_v22  ;;  %v2139_v14 = vsub.f32 %v6978_v57, %v7602_v58  ;;  %v2146_v29 = vsub.f32 %v6980_v1, %v7601_v15  ;;  %v7036_v15 = vsub.f32 %v6753_v19, %v1926_v52 }
 0x2ad   : > { %v2041_v40 = vsub.f32 %v6889_v51, %v2040_v47  ;;  %v2119_v24 = vand.u32 4294901760, %v2118_v34  ;;  %v7023_v34 = vpack.c.bf16 %v6980_v1, %v6978_v57  ;;  %v7658_v51 = vand.u32 4294901760, %v6912_v17 }
 0x2ae   : > { %v2098_v56 = vand.u32 4294901760, %v2097_v28  ;;  %v2140_v45 = vand.u32 4294901760, %v2139_v14  ;;  %v2147_v59 = vand.u32 4294901760, %v2146_v29  ;;  %v7003_v28 = vpack.c.bf16 %v6914_v36, %v6912_v17 }
 0x2af   : > { %5402 = vmatpush3.bf16.msra.mxu0 %v6880_v44  ;;  %v2042_v0 = vand.u32 4294901760, %v2041_v40  ;;  %v2111_v40 = vsub.f32 %v6951_v9, %v7606_v4  ;;  %v7663_v17 = vand.u32 4294901760, %v6938_v18 }
 0x2b0   : > { %5404 = vmatprep.subr.bf16.mxu0 %v6884_v50  ;;  %v6959_v16 = vpack.c.bf16 %v2105_v2, %v2098_v56  ;;  %v6995_v48 = vpack.c.bf16 %v2147_v59, %v2140_v45  ;;  %v7011_v56 = vpack.c.bf16 %v6938_v18, %v6936_v12  ;;  %v7015_v2 = vpack.c.bf16 %v6953_v41, %v6951_v9 }
 0x2b1   : > { %v6910_v13 = vpack.c.bf16 %v2049_v6, %v2042_v0  ;;  %v2112_v43 = vand.u32 4294901760, %v2111_v40  ;;  %v7604_v0 = vand.u32 4294901760, %v6967_v21  ;;  %v7603_v6 = vand.u32 4294901760, %v6969_v63 }
 0x2b2   : > { %v7019_v40 = vpack.c.bf16 %v6969_v63, %v6967_v21  ;;  %v7031_v59 = vsub.f32 %v6748_v23, %v1923_v61  ;;  %v7669_v18 = vand.u32 4294901760, %v6980_v1 }
 0x2b3   : > { %5406 = vmatpush3.bf16.msra.mxu0 %v6884_v50  ;;  %v6973_v60 = vpack.c.bf16 %v2119_v24, %v2112_v43  ;;  %v2125_v32 = vsub.f32 %v6967_v21, %v7604_v0  ;;  %v2132_v35 = vsub.f32 %v6969_v63, %v7603_v6  ;;  %v3596_v43 = vld [vmem:[%s7572_s3 + $0x1] ss:$0 sm:$0xff] }
 0x2b4   : > { %5408 = vmatprep.subr.bf16.mxu0 %v6900_v38 }
 0x2b5   : > { %v2126_v55 = vand.u32 4294901760, %v2125_v32  ;;  %v2133_v46 = vand.u32 4294901760, %v2132_v35 }
 0x2b7   : > { %5410 = vmatpush3.bf16.msra.mxu0 %v6900_v38  ;;  %v6993_v26 = vpack.c.bf16 %v2133_v46, %v2126_v55 }
 0x2b8   : > { %5412 = vmatprep.subr.bf16.mxu0 %v6910_v13 }
 0x378   : > { %v4535_v24 = vpop.f32.mrb[0].mxu1 }
 0x379   : > { %v5767_v32 = vadd.f32 %v4535_v24, %v3596_v43  ;;  %v1865_v35 = vpop.f32.mrb[1].mxu1  ;;  %v2054_v24 = vand.u32 4294901760, %v7031_v59 }
 0x37a   : > { %v5768_v55 = vadd.f32 %v3596_v43, %v1865_v35 }
 0x37b   : > { %5899 = vtanh.f32 %v5767_v32  ;;  %v7613_v32 = vand.u32 4294901760, %v7036_v15  ;;  %v2055_v23 = vsub.f32 %v7031_v59, %v2054_v24 }
 0x37c   : > { %5901 = vtanh.f32 %v5768_v55  ;;  %v4538_v46 = vpop.f32.mrb[2].mxu1 }
 0x37d   : > { %v5769_v14 = vadd.f32 %v4538_v46, %v3596_v43  ;;  %v1877_v29 = vpop.f32.mrb[3].mxu1  ;;  %v2062_v19 = vsub.f32 %v7036_v15, %v7613_v32  ;;  %v2056_v39 = vand.u32 4294901760, %v2055_v23 }
 0x37e   : > { %v5770_v45 = vadd.f32 %v3596_v43, %v1877_v29 }
 0x37f   : > { %5903 = vtanh.f32 %v5769_v14  ;;  %v2063_v4 = vand.u32 4294901760, %v2062_v19 }
 0x380   : > { %5905 = vtanh.f32 %v5770_v45 }
 0x381   : > { %v5415_v32 = vpack.c.bf16 %v2063_v4, %v2056_v39  ;;  %v7112_v39 = vld [vmem:[#allocation6 + $0x18] sm:$0xff] }
 0x385   : > { %v5900_v35 = vpop.eup %5899 }
 0x386   : > { %v5902_v55 = vpop.eup %5901  ;;  %v7040_v46 = vand.u32 4294901760, %v5900_v35 }
 0x387   : > { %v7042_v43 = vand.u32 4294901760, %v5902_v55 }
 0x388   : > { %v7045_v14 = vsub.f32 %v5900_v35, %v7040_v46 }
 0x389   : > { %v5904_v61 = vpop.eup %5903  ;;  %v7054_v52 = vsub.f32 %v5902_v55, %v7042_v43 }
 0x38a   : > { %v5906_v29 = vpop.eup %5905  ;;  %v7056_v45 = vand.u32 4294901760, %v5904_v61  ;;  %v2009_v58 = vand.u32 4294901760, %v7045_v14 }
 0x38b   : > { %v7059_v6 = vand.u32 4294901760, %v5906_v29  ;;  %v1999_v35 = vand.u32 4294901760, %v7054_v52 }
 0x38c   : > { %v2010_v0 = vsub.f32 %v7045_v14, %v2009_v58  ;;  %v7066_v62 = vsub.f32 %v5904_v61, %v7056_v45 }
 0x38d   : > { %v2000_v55 = vsub.f32 %v7054_v52, %v1999_v35  ;;  %v7072_v22 = vsub.f32 %v5906_v29, %v7059_v6 }
 0x38e   : > { %v2029_v10 = vand.u32 4294901760, %v7066_v62  ;;  %v2011_v37 = vand.u32 4294901760, %v2010_v0  ;;  %v2723_v0 = vand.u32 4294901760, %v7112_v39 }
 0x38f   : > { %v2001_v33 = vand.u32 4294901760, %v2000_v55  ;;  %v2019_v7 = vand.u32 4294901760, %v7072_v22  ;;  %v2704_v55 = vld [vmem:[#allocation6 + $0x70] sm:$0xff] }
 0x390   : > { %v2030_v23 = vsub.f32 %v7066_v62, %v2029_v10 }
 0x391   : > { %4571 = vmatprep.mubr.f32.mxu0 %v2001_v33  ;;  %v2020_v19 = vsub.f32 %v7072_v22, %v2019_v7  ;;  %v7105_v33 = vld [vmem:[#allocation6 + $0x8] sm:$0xff] }
 0x392   : > { %4572 = vmatmul.mubr.f32.vlgmr.msra.gmra.mrb[4].mxu0 %v2011_v37  ;;  %v2031_v29 = vand.u32 4294901760, %v2030_v23  ;;  %v7103_v37 = vld [vmem:[#allocation6] sm:$0xff]  ;;  %v2717_v4 = vand.u32 4294901760, %v7105_v33  ;;  %v2705_v23 = vld [vmem:[#allocation6 + $0x78] sm:$0xff] }
 0x393   : > { %5414 = vmatpush3.bf16.msra.mxu0 %v6910_v13  ;;  %v2021_v61 = vand.u32 4294901760, %v2020_v19  ;;  %v5447_v13 = vpack.c.bf16 %v7036_v15, %v7031_v59  ;;  %v2756_v19 = vand.u32 4294901760, %v2704_v55 }
 0x394   : > { %5416 = vmatprep.subr.bf16.mxu0 %v5415_v32 }
 0x395   : > { %4574 = vmatprep.mubr.f32.mxu0 %v2021_v61  ;;  %v2759_v61 = vand.u32 4294901760, %v2705_v23 }
 0x396   : > { %4575 = vmatmul.mubr.f32.gmra.mrb[6].mxu0 %v2031_v29 }
 0x397   : > { %5418 = vmatpush3.bf16.msra.mxu0 %v5415_v32  ;;  %4609 = vmatprep.mubr.f32.mxu0 %v7042_v43  ;;  %v2702_v32 = vld [vmem:[#allocation6 + $0x60] sm:$0xff] }
 0x398   : > { %5420 = vmatprep.subr.bf16.mxu0 %v6931_v25 }
 0x39b   : > { %5422 = vmatpush3.bf16.msra.mxu0 %v6931_v25  ;;  %v7107_v25 = vld [vmem:[#allocation6 + $0x10] sm:$0xff] }
 0x39c   : > { %5424 = vmatprep.subr.bf16.mxu0 %v6955_v54 }
 0x39f   : > { %5426 = vmatpush3.bf16.msra.mxu0 %v6955_v54  ;;  %v2714_v54 = vand.u32 4294901760, %v7103_v37 }
 0x3a0   : > { %5428 = vmatprep.subr.bf16.mxu0 %v6959_v16 }
 0x3a3   : > { %5430 = vmatpush3.bf16.msra.mxu0 %v6959_v16  ;;  %v2720_v16 = vand.u32 4294901760, %v7107_v25 }
 0x3a4   : > { %5432 = vmatprep.subr.bf16.mxu0 %v6973_v60 }
 0x3a7   : > { %5434 = vmatpush3.bf16.msra.mxu0 %v6973_v60  ;;  %v7121_v60 = vpack.c.bf16 %v2717_v4, %v2714_v54 }
 0x3a8   : > { %5436 = vmatprep.subr.bf16.mxu0 %v6993_v26 }
 0x3a9   : > { %5572 = vmatprep.subr.bf16.mxu1 %v7121_v60 }
 0x3aa   : > { %5574 = vmatpush3.bf16.msra.mxu1 %v7121_v60 }
 0x3ab   : > { %5438 = vmatpush3.bf16.msra.mxu0 %v6993_v26  ;;  %v7127_v26 = vpack.c.bf16 %v2723_v0, %v2720_v16 }
 0x3ac   : > { %5440 = vmatprep.subr.bf16.mxu0 %v6995_v48 }
 0x3ad   : > { %5576 = vmatprep.subr.bf16.mxu1 %v7127_v26 }
 0x3ae   : > { %5578 = vmatpush3.bf16.msra.mxu1 %v7127_v26 }
 0x3af   : > { %5442 = vmatpush3.bf16.msra.mxu0 %v6995_v48  ;;  %v5507_v48 = vpack.c.bf16 %v2047_v53, %v2040_v47  ;;  %v5515_v47 = vpack.c.bf16 %v7659_v30, %v7658_v51  ;;  %v7660_v53 = vand.u32 4294901760, %v6925_v20  ;;  %v7666_v20 = vand.u32 4294901760, %v6967_v21  ;;  %v2698_v21 = vld [vmem:[#allocation6 + $0x40] sm:$0xff] }
 0x3b0   : > { %5444 = vmatprep.subr.bf16.mxu0 %v6999_v5 }
 0x3b2   : > { %4610 = vmatmul.mubr.f32.vlgmr.msra.gmra.mrb[4].mxu0 %v7040_v46 }
 0x3b3   : > { %4612 = vmatprep.mubr.f32.mxu0 %v7059_v6  ;;  %5446 = vmatpush3.bf16.msra.mxu0 %v6999_v5  ;;  %v7657_v5 = vand.u32 4294901760, %v7036_v15 }
 0x3b4   : > { %5448 = vmatprep.subr.bf16.mxu0 %v5447_v13 }
 0x3b6   : > { %4613 = vmatmul.mubr.f32.gmra.mrb[6].mxu0 %v7056_v45 }
 0x3b7   : > { %5450 = vmatpush3.bf16.msra.mxu0 %v5447_v13  ;;  %4647 = vmatprep.mubr.f32.mxu0 %v7054_v52 }
 0x3b8   : > { %5452 = vmatprep.subr.bf16.mxu0 %v7003_v28 }
 0x3bb   : > { %5454 = vmatpush3.bf16.msra.mxu0 %v7003_v28  ;;  %v5511_v28 = vpack.c.bf16 %v7657_v5, %v2054_v24 }
 0x3bc   : > { %5456 = vmatprep.subr.bf16.mxu0 %v7007_v3 }
 0x3bf   : > { %5458 = vmatpush3.bf16.msra.mxu0 %v7007_v3 }
 0x3c0   : > { %5460 = vmatprep.subr.bf16.mxu0 %v7011_v56 }
 0x3c3   : > { %5462 = vmatpush3.bf16.msra.mxu0 %v7011_v56 }
 0x3c4   : > { %5464 = vmatprep.subr.bf16.mxu0 %v7015_v2 }
 0x3c7   : > { %5466 = vmatpush3.bf16.msra.mxu0 %v7015_v2  ;;  %v2700_v2 = vld [vmem:[#allocation6 + $0x50] sm:$0xff] }
 0x3c8   : > { %5468 = vmatprep.subr.bf16.mxu0 %v7019_v40 }
 0x3cb   : > { %5470 = vmatpush3.bf16.msra.mxu0 %v7019_v40  ;;  %v2701_v40 = vld [vmem:[#allocation6 + $0x58] sm:$0xff] }
 0x3cc   : > { %5472 = vmatprep.subr.bf16.mxu0 %v7023_v34  ;;  %v2747_v59 = vand.u32 4294901760, %v2701_v40 }
 0x3cf   : > { %5474 = vmatpush3.bf16.msra.mxu0 %v7023_v34  ;;  %v2744_v34 = vand.u32 4294901760, %v2700_v2 }
 0x3d0   : > { %5476 = vmatprep.subr.bf16.mxu0 %v6762_v27 }
 0x3d1   : > { %v7239_v24 = vpack.c.bf16 %v2747_v59, %v2744_v34 }
 0x3d2   : > { %4648 = vmatmul.mubr.f32.vlgmr.msra.gmra.mrb[4].mxu0 %v7045_v14 }
 0x3d3   : > { %4650 = vmatprep.mubr.f32.mxu0 %v7072_v22  ;;  %5478 = vmatpush3.bf16.msra.mxu0 %v6762_v27 }
 0x3d4   : > { %5480 = vmatprep.subr.bf16.mxu0 %v6768_v42 }
 0x3d6   : > { %4651 = vmatmul.mubr.f32.gmra.mrb[6].mxu0 %v7066_v62  ;;  %v7665_v62 = vand.u32 4294901760, %v6953_v41 }
 0x3d7   : > { %5482 = vmatpush3.bf16.msra.mxu0 %v6768_v42  ;;  %4685 = vmatprep.mubr.f32.mxu0 %v1999_v35  ;;  %v7253_v35 = vsub.f32 %v7105_v33, %v2717_v4 }
 0x3d8   : > { %5484 = vmatprep.subr.bf16.mxu0 %v6868_v31 }
 0x3d9   : > { %v2844_v13 = vand.u32 4294901760, %v7253_v35 }
 0x3db   : > { %5486 = vmatpush3.bf16.msra.mxu0 %v6868_v31  ;;  %v2845_v33 = vsub.f32 %v7253_v35, %v2844_v13 }
 0x3dc   : > { %5488 = vmatprep.subr.bf16.mxu0 %v6872_v8 }
 0x3dd   : > { %v2846_v4 = vand.u32 4294901760, %v2845_v33 }
 0x3df   : > { %5490 = vmatpush3.bf16.msra.mxu0 %v6872_v8 }
 0x3e0   : > { %5492 = vmatprep.subr.bf16.mxu0 %v6876_v11 }
 0x3e3   : > { %5494 = vmatpush3.bf16.msra.mxu0 %v6876_v11 }
 0x3e4   : > { %5496 = vmatprep.subr.bf16.mxu0 %v6880_v44 }
 0x3e7   : > { %5498 = vmatpush3.bf16.msra.mxu0 %v6880_v44 }
 0x3e8   : > { %5500 = vmatprep.subr.bf16.mxu0 %v6884_v50 }
 0x3eb   : > { %5502 = vmatpush3.bf16.msra.mxu0 %v6884_v50 }
 0x3ec   : > { %5504 = vmatprep.subr.bf16.mxu0 %v6900_v38 }
 0x3ef   : > { %5506 = vmatpush3.bf16.msra.mxu0 %v6900_v38 }
 0x3f0   : > { %5508 = vmatprep.subr.bf16.mxu0 %v5507_v48 }
 0x3f2   : > { %4686 = vmatmul.mubr.f32.vlgmr.msra.gmra.mrb[4].mxu0 %v2009_v58  ;;  %v7661_v58 = vand.u32 4294901760, %v6927_v49  ;;  %v7667_v49 = vand.u32 4294901760, %v6969_v63  ;;  %v2699_v63 = vld [vmem:[#allocation6 + $0x48] sm:$0xff] }
 0x3f3   : > { %4688 = vmatprep.mubr.f32.mxu0 %v2019_v7  ;;  %5510 = vmatpush3.bf16.msra.mxu0 %v5507_v48  ;;  %v7662_v7 = vand.u32 4294901760, %v6936_v12  ;;  %v7668_v12 = vand.u32 4294901760, %v6978_v57  ;;  %v2741_v57 = vand.u32 4294901760, %v2699_v63  ;;  %v7259_v48 = vpack.c.bf16 %v2759_v61, %v2756_v19 }
 0x3f4   : > { %5512 = vmatprep.subr.bf16.mxu0 %v5511_v28  ;;  %v5519_v22 = vpack.c.bf16 %v7661_v58, %v7660_v53  ;;  %v5531_v3 = vpack.c.bf16 %v7667_v49, %v7666_v20 }
 0x3f5   : > { %v5523_v36 = vpack.c.bf16 %v7663_v17, %v7662_v7  ;;  %v5535_v56 = vpack.c.bf16 %v7669_v18, %v7668_v12 }
 0x3f6   : > { %4689 = vmatmul.mubr.f32.gmra.mrb[6].mxu0 %v2029_v10  ;;  %v7664_v10 = vand.u32 4294901760, %v6951_v9  ;;  %v2697_v9 = vld [vmem:[#allocation6 + $0x38] sm:$0xff] }
 0x3f7   : > { %5514 = vmatpush3.bf16.msra.mxu0 %v5511_v28  ;;  %4723 = vmatprep.mubr.f32.mxu0 %v7042_v43  ;;  %v2735_v41 = vand.u32 4294901760, %v2697_v9 }
 0x3f8   : > { %5516 = vmatprep.subr.bf16.mxu0 %v5515_v47  ;;  %v5527_v15 = vpack.c.bf16 %v7665_v62, %v7664_v10 }
 0x3f9   : > { %v7286_v7 = vsub.f32 %v2697_v9, %v2735_v41  ;;  %v7312_v9 = vsub.f32 %v2701_v40, %v2747_v59 }
 0x3fb   : > { %5518 = vmatpush3.bf16.msra.mxu0 %v5515_v47  ;;  %v7622_v62 = vand.u32 4294901760, %v7286_v7 }
 0x3fc   : > { %5520 = vmatprep.subr.bf16.mxu0 %v5519_v22 }
 0x3fd   : > { %v2887_v12 = vsub.f32 %v7286_v7, %v7622_v62 }
 0x3ff   : > { %5522 = vmatpush3.bf16.msra.mxu0 %v5519_v22 }
 0x400   : > { %5524 = vmatprep.subr.bf16.mxu0 %v5523_v36 }
 0x403   : > { %5526 = vmatpush3.bf16.msra.mxu0 %v5523_v36 }
 0x404   : > { %5528 = vmatprep.subr.bf16.mxu0 %v5527_v15 }
 0x407   : > { %5530 = vmatpush3.bf16.msra.mxu0 %v5527_v15 }
 0x408   : > { %5532 = vmatprep.subr.bf16.mxu0 %v5531_v3 }
 0x40b   : > { %5534 = vmatpush3.bf16.msra.mxu0 %v5531_v3  ;;  %v7297_v3 = vsub.f32 %v2699_v63, %v2741_v57 }
 0x40c   : > { %5536 = vmatprep.subr.bf16.mxu0 %v5535_v56 }
 0x40f   : > { %5538 = vmatpush3.bf16.msra.mxu0 %v5535_v56 }
 0x410   : > { %5540 = vmatprep.subr.bf16.mxu0 %v6762_v27 }
 0x412   : > { %4724 = vmatmul.mubr.f32.vlgmr.msra.gmra.mrb[4].mxu0 %v7040_v46 }
 0x413   : > { %4726 = vmatprep.mubr.f32.mxu0 %v7059_v6  ;;  %5542 = vmatpush3.bf16.msra.mxu0 %v6762_v27  ;;  %v2694_v27 = vld [vmem:[#allocation6 + $0x20] sm:$0xff] }
 0x414   : > { %5544 = vmatprep.subr.bf16.mxu0 %v6768_v42 }
 0x416   : > { %4727 = vmatmul.mubr.f32.gmra.mrb[6].mxu0 %v7056_v45 }
 0x417   : > { %5546 = vmatpush3.bf16.msra.mxu0 %v6768_v42  ;;  %4761 = vmatprep.mubr.f32.mxu0 %v7042_v43  ;;  %v2695_v42 = vld [vmem:[#allocation6 + $0x28] sm:$0xff]  ;;  %v2750_v43 = vand.u32 4294901760, %v2702_v32 }
 0x418   : > { %5548 = vmatprep.subr.bf16.mxu0 %v6868_v31 }
 0x419   : > { %v7326_v40 = vsub.f32 %v2702_v32, %v2750_v43 }
 0x41b   : > { %5550 = vmatpush3.bf16.msra.mxu0 %v6868_v31  ;;  %v2726_v31 = vand.u32 4294901760, %v2694_v27 }
 0x41c   : > { %5552 = vmatprep.subr.bf16.mxu0 %v6872_v8 }
 0x41d   : > { %v7271_v28 = vsub.f32 %v2694_v27, %v2726_v31  ;;  %v7620_v27 = vand.u32 4294901760, %v7297_v3 }
 0x41f   : > { %5554 = vmatpush3.bf16.msra.mxu0 %v6872_v8  ;;  %v2729_v8 = vand.u32 4294901760, %v2695_v42  ;;  %v7625_v30 = vand.u32 4294901760, %v7271_v28 }
 0x420   : > { %5556 = vmatprep.subr.bf16.mxu0 %v6876_v11 }
 0x421   : > { %v7273_v51 = vsub.f32 %v2695_v42, %v2729_v8  ;;  %v2866_v53 = vsub.f32 %v7271_v28, %v7625_v30  ;;  %v2888_v42 = vand.u32 4294901760, %v2887_v12 }
 0x423   : > { %5558 = vmatpush3.bf16.msra.mxu0 %v6876_v11  ;;  %v7227_v11 = vpack.c.bf16 %v2729_v8, %v2726_v31  ;;  %v7624_v47 = vand.u32 4294901760, %v7273_v51  ;;  %v2867_v17 = vand.u32 4294901760, %v2866_v53  ;;  %v2901_v8 = vsub.f32 %v7297_v3, %v7620_v27 }
 0x424   : > { %5560 = vmatprep.subr.bf16.mxu0 %v6880_v44 }
 0x425   : > { %5580 = vmatprep.subr.bf16.mxu1 %v7227_v11  ;;  %v2873_v58 = vsub.f32 %v7273_v51, %v7624_v47 }
 0x426   : > { %5582 = vmatpush3.bf16.msra.mxu1 %v7227_v11 }
 0x427   : > { %5562 = vmatpush3.bf16.msra.mxu0 %v6880_v44  ;;  %v2696_v44 = vld [vmem:[#allocation6 + $0x30] sm:$0xff]  ;;  %v2874_v36 = vand.u32 4294901760, %v2873_v58 }
 0x428   : > { %5564 = vmatprep.subr.bf16.mxu0 %v6884_v50 }
 0x429   : > { %v7290_v15 = vpack.c.bf16 %v2874_v36, %v2867_v17  ;;  %v7337_v17 = vsub.f32 %v2704_v55, %v2756_v19  ;;  %v7339_v36 = vsub.f32 %v2705_v23, %v2759_v61 }
 0x42b   : > { %5566 = vmatpush3.bf16.msra.mxu0 %v6884_v50  ;;  %v2732_v50 = vand.u32 4294901760, %v2696_v44 }
 0x42c   : > { %5568 = vmatprep.subr.bf16.mxu0 %v6900_v38 }
 0x42d   : > { %v7284_v22 = vsub.f32 %v2696_v44, %v2732_v50  ;;  %v7310_v44 = vsub.f32 %v2700_v2, %v2744_v34 }
 0x42f   : > { %5570 = vmatpush3.bf16.msra.mxu0 %v6900_v38  ;;  %v7231_v38 = vpack.c.bf16 %v2735_v41, %v2732_v50  ;;  %v7623_v10 = vand.u32 4294901760, %v7284_v22  ;;  %v7619_v63 = vand.u32 4294901760, %v7310_v44 }
 0x431   : > { %5584 = vmatprep.subr.bf16.mxu1 %v7231_v38  ;;  %v2880_v20 = vsub.f32 %v7284_v22, %v7623_v10 }
 0x432   : > { %4762 = vmatmul.mubr.f32.vlgmr.msra.gmra.mrb[4].mxu0 %v7040_v46  ;;  %5586 = vmatpush3.bf16.msra.mxu1 %v7231_v38  ;;  %v2703_v46 = vld [vmem:[#allocation6 + $0x68] sm:$0xff] }
 0x433   : > { %4764 = vmatprep.mubr.f32.mxu0 %v7059_v6  ;;  %v2738_v6 = vand.u32 4294901760, %v2698_v21  ;;  %v2753_v14 = vand.u32 4294901760, %v2703_v46  ;;  %v2881_v18 = vand.u32 4294901760, %v2880_v20 }
 0x435   : > { %v7235_v1 = vpack.c.bf16 %v2741_v57, %v2738_v6  ;;  %v7243_v52 = vpack.c.bf16 %v2753_v14, %v2750_v43  ;;  %v7295_v49 = vsub.f32 %v2698_v21, %v2738_v6  ;;  %v7314_v50 = vpack.c.bf16 %v2888_v42, %v2881_v18 }
 0x436   : > { %4765 = vmatmul.mubr.f32.gmra.mrb[6].mxu0 %v7056_v45  ;;  %v7248_v45 = vsub.f32 %v7103_v37, %v2714_v54  ;;  %v2902_v21 = vand.u32 4294901760, %v2901_v8  ;;  %v7618_v6 = vand.u32 4294901760, %v7312_v9  ;;  %v7328_v34 = vsub.f32 %v2703_v46, %v2753_v14 }
 0x437   : > { %5588 = vmatprep.subr.bf16.mxu1 %v7235_v1  ;;  %v7621_v56 = vand.u32 4294901760, %v7295_v49  ;;  %v7615_v43 = vand.u32 4294901760, %v7337_v17  ;;  %v7614_v14 = vand.u32 4294901760, %v7339_v36  ;;  %v7366_v8 = vpack.c.bf16 %v7286_v7, %v7284_v22 }
 0x438   : > { %5590 = vmatpush3.bf16.msra.mxu1 %v7235_v1  ;;  %v2837_v29 = vand.u32 4294901760, %v7248_v45  ;;  %v2915_v2 = vsub.f32 %v7312_v9, %v7618_v6  ;;  %v7358_v42 = vpack.c.bf16 %v7253_v35, %v7248_v45  ;;  %v7672_v35 = vand.u32 4294901760, %v7273_v51 }
 0x439   : > { %5592 = vmatprep.subr.bf16.mxu1 %v7239_v24  ;;  %v2894_v31 = vsub.f32 %v7295_v49, %v7621_v56  ;;  %v2936_v12 = vsub.f32 %v7337_v17, %v7615_v43  ;;  %v2943_v55 = vsub.f32 %v7339_v36, %v7614_v14  ;;  %v7395_v14 = vsub.f32 %v7112_v39, %v2723_v0 }
 0x43a   : > { %v2838_v37 = vsub.f32 %v7248_v45, %v2837_v29  ;;  %v2916_v33 = vand.u32 4294901760, %v2915_v2  ;;  %v7382_v2 = vpack.c.bf16 %v7339_v36, %v7337_v17  ;;  %v7671_v45 = vand.u32 4294901760, %v7271_v28 }
 0x43b   : > { %v2895_v41 = vand.u32 4294901760, %v2894_v31  ;;  %v2937_v19 = vand.u32 4294901760, %v2936_v12  ;;  %v2944_v61 = vand.u32 4294901760, %v2943_v55  ;;  %v7362_v31 = vpack.c.bf16 %v7273_v51, %v7271_v28 }
 0x43c   : > { %5594 = vmatpush3.bf16.msra.mxu1 %v7239_v24  ;;  %v2839_v54 = vand.u32 4294901760, %v2838_v37  ;;  %v2908_v37 = vsub.f32 %v7310_v44, %v7619_v63  ;;  %v7676_v28 = vand.u32 4294901760, %v7297_v3 }
 0x43d   : > { %5596 = vmatprep.subr.bf16.mxu1 %v7243_v52  ;;  %v7318_v57 = vpack.c.bf16 %v2902_v21, %v2895_v41  ;;  %v7354_v18 = vpack.c.bf16 %v2944_v61, %v2937_v19  ;;  %v7370_v41 = vpack.c.bf16 %v7297_v3, %v7295_v49  ;;  %v7374_v21 = vpack.c.bf16 %v7312_v9, %v7310_v44 }
 0x43e   : > { %v7269_v5 = vpack.c.bf16 %v2846_v4, %v2839_v54  ;;  %v2909_v59 = vand.u32 4294901760, %v2908_v37  ;;  %v7617_v54 = vand.u32 4294901760, %v7326_v40  ;;  %v7616_v4 = vand.u32 4294901760, %v7328_v34 }
 0x43f   : > { %v7378_v37 = vpack.c.bf16 %v7328_v34, %v7326_v40  ;;  %v7390_v61 = vsub.f32 %v7107_v25, %v2720_v16  ;;  %v7682_v3 = vand.u32 4294901760, %v7339_v36 }
 0x440   : > { %5598 = vmatpush3.bf16.msra.mxu1 %v7243_v52  ;;  %v7332_v53 = vpack.c.bf16 %v2916_v33, %v2909_v59  ;;  %v2922_v58 = vsub.f32 %v7326_v40, %v7617_v54  ;;  %v2929_v32 = vsub.f32 %v7328_v34, %v7616_v4  ;;  %v3598_v59 = vld [vmem:[%s7572_s3 + $0x2] ss:$0 sm:$0xff] }
 0x441   : > { %5600 = vmatprep.subr.bf16.mxu1 %v7259_v48 }
 0x442   : > { %v2923_v46 = vand.u32 4294901760, %v2922_v58  ;;  %v2930_v20 = vand.u32 4294901760, %v2929_v32 }
 0x444   : > { %5602 = vmatpush3.bf16.msra.mxu1 %v7259_v48  ;;  %v7352_v23 = vpack.c.bf16 %v2930_v20, %v2923_v46 }
 0x445   : > { %5604 = vmatprep.subr.bf16.mxu1 %v7269_v5 }
 0x505   : > { %v4763_v33 = vpop.f32.mrb[4].mxu0 }
 0x506   : > { %v5771_v58 = vadd.f32 %v4763_v33, %v3598_v59  ;;  %v2664_v32 = vpop.f32.mrb[5].mxu0  ;;  %v2851_v33 = vand.u32 4294901760, %v7390_v61 }
 0x507   : > { %v5772_v46 = vadd.f32 %v3598_v59, %v2664_v32 }
 0x508   : > { %5907 = vtanh.f32 %v5771_v58  ;;  %v7626_v58 = vand.u32 4294901760, %v7395_v14  ;;  %v2852_v25 = vsub.f32 %v7390_v61, %v2851_v33 }
 0x509   : > { %5909 = vtanh.f32 %v5772_v46  ;;  %v4766_v20 = vpop.f32.mrb[6].mxu0 }
 0x50a   : > { %v5773_v12 = vadd.f32 %v4766_v20, %v3598_v59  ;;  %v2676_v55 = vpop.f32.mrb[7].mxu0  ;;  %v2859_v39 = vsub.f32 %v7395_v14, %v7626_v58  ;;  %v2853_v6 = vand.u32 4294901760, %v2852_v25 }
 0x50b   : > { %v5774_v19 = vadd.f32 %v3598_v59, %v2676_v55 }
 0x50c   : > { %5911 = vtanh.f32 %v5773_v12  ;;  %v2860_v63 = vand.u32 4294901760, %v2859_v39 }
 0x50d   : > { %5913 = vtanh.f32 %v5774_v19 }
 0x50e   : > { %v5607_v58 = vpack.c.bf16 %v2860_v63, %v2853_v6 }
 0x512   : > { %v5908_v32 = vpop.eup %5907 }
 0x513   : > { %v5910_v46 = vpop.eup %5909  ;;  %v7399_v20 = vand.u32 4294901760, %v5908_v32 }
 0x514   : > { %v7401_v59 = vand.u32 4294901760, %v5910_v46 }
 0x515   : > { %v7404_v12 = vsub.f32 %v5908_v32, %v7399_v20 }
 0x516   : > { %v5912_v16 = vpop.eup %5911  ;;  %v7413_v0 = vsub.f32 %v5910_v46, %v7401_v59 }
 0x517   : > { %v5914_v55 = vpop.eup %5913  ;;  %v7415_v19 = vand.u32 4294901760, %v5912_v16  ;;  %v2806_v43 = vand.u32 4294901760, %v7404_v12 }
 0x518   : > { %v7418_v4 = vand.u32 4294901760, %v5914_v55  ;;  %v2796_v32 = vand.u32 4294901760, %v7413_v0 }
 0x519   : > { %v2807_v54 = vsub.f32 %v7404_v12, %v2806_v43  ;;  %v7425_v27 = vsub.f32 %v5912_v16, %v7415_v19 }
 0x51a   : > { %v2797_v46 = vsub.f32 %v7413_v0, %v2796_v32  ;;  %v7431_v56 = vsub.f32 %v5914_v55, %v7418_v4 }
 0x51b   : > { %v2826_v62 = vand.u32 4294901760, %v7425_v27  ;;  %v2808_v30 = vand.u32 4294901760, %v2807_v54 }
 0x51c   : > { %v2798_v10 = vand.u32 4294901760, %v2797_v46  ;;  %v2816_v47 = vand.u32 4294901760, %v7431_v56 }
 0x51d   : > { %v2827_v25 = vsub.f32 %v7425_v27, %v2826_v62 }
 0x51e   : > { %4799 = vmatprep.mubr.f32.mxu1 %v2798_v10  ;;  %v2817_v39 = vsub.f32 %v7431_v56, %v2816_v47  ;;  %v7670_v10 = vand.u32 4294901760, %v7395_v14 }
 0x51f   : > { %4800 = vmatmul.mubr.f32.vlgmr.msra.gmra.mrb[4].mxu1 %v2808_v30  ;;  %v2828_v55 = vand.u32 4294901760, %v2827_v25  ;;  %v5699_v30 = vpack.c.bf16 %v2844_v13, %v2837_v29  ;;  %v5707_v29 = vpack.c.bf16 %v7672_v35, %v7671_v45  ;;  %v7673_v13 = vand.u32 4294901760, %v7284_v22 }
 0x520   : > { %5606 = vmatpush3.bf16.msra.mxu1 %v7269_v5  ;;  %v2818_v16 = vand.u32 4294901760, %v2817_v39  ;;  %v5639_v5 = vpack.c.bf16 %v7395_v14, %v7390_v61  ;;  %v7679_v22 = vand.u32 4294901760, %v7326_v40 }
 0x521   : > { %5608 = vmatprep.subr.bf16.mxu1 %v5607_v58 }
 0x522   : > { %4802 = vmatprep.mubr.f32.mxu1 %v2818_v16 }
 0x523   : > { %4803 = vmatmul.mubr.f32.gmra.mrb[6].mxu1 %v2828_v55 }
 0x524   : > { %5610 = vmatpush3.bf16.msra.mxu1 %v5607_v58  ;;  %4837 = vmatprep.mubr.f32.mxu1 %v7401_v59 }
 0x525   : > { %5612 = vmatprep.subr.bf16.mxu1 %v7290_v15 }
 0x528   : > { %5614 = vmatpush3.bf16.msra.mxu1 %v7290_v15  ;;  %v5703_v15 = vpack.c.bf16 %v7670_v10, %v2851_v33 }
 0x529   : > { %5616 = vmatprep.subr.bf16.mxu1 %v7314_v50 }
 0x52c   : > { %5618 = vmatpush3.bf16.msra.mxu1 %v7314_v50  ;;  %v7674_v50 = vand.u32 4294901760, %v7286_v7  ;;  %v7680_v7 = vand.u32 4294901760, %v7328_v34 }
 0x52d   : > { %5620 = vmatprep.subr.bf16.mxu1 %v7318_v57 }
 0x52e   : > { %v5723_v6 = vpack.c.bf16 %v7680_v7, %v7679_v22 }
 0x530   : > { %5622 = vmatpush3.bf16.msra.mxu1 %v7318_v57 }
 0x531   : > { %5624 = vmatprep.subr.bf16.mxu1 %v7332_v53 }
 0x534   : > { %5626 = vmatpush3.bf16.msra.mxu1 %v7332_v53  ;;  %v3494_v53 = vstv %s3483_s19 }
 0x535   : > { %5628 = vmatprep.subr.bf16.mxu1 %v7352_v23 }
 0x538   : > { %5630 = vmatpush3.bf16.msra.mxu1 %v7352_v23 }
 0x539   : > { %5632 = vmatprep.subr.bf16.mxu1 %v7354_v18 }
 0x53c   : > { %5634 = vmatpush3.bf16.msra.mxu1 %v7354_v18 }
 0x53d   : > { %5636 = vmatprep.subr.bf16.mxu1 %v7358_v42 }
 0x53f   : > { %4838 = vmatmul.mubr.f32.vlgmr.msra.gmra.mrb[4].mxu1 %v7399_v20 }
 0x540   : > { %4840 = vmatprep.mubr.f32.mxu1 %v7418_v4  ;;  %5638 = vmatpush3.bf16.msra.mxu1 %v7358_v42 }
 0x541   : > { %5640 = vmatprep.subr.bf16.mxu1 %v5639_v5 }
 0x543   : > { %4841 = vmatmul.mubr.f32.gmra.mrb[6].mxu1 %v7415_v19 }
 0x544   : > { %5642 = vmatpush3.bf16.msra.mxu1 %v5639_v5  ;;  %4875 = vmatprep.mubr.f32.mxu1 %v7413_v0 }
 0x545   : > { %5644 = vmatprep.subr.bf16.mxu1 %v7362_v31 }
 0x548   : > { %5646 = vmatpush3.bf16.msra.mxu1 %v7362_v31 }
 0x549   : > { %5648 = vmatprep.subr.bf16.mxu1 %v7366_v8 }
 0x54c   : > { %5650 = vmatpush3.bf16.msra.mxu1 %v7366_v8 }
 0x54d   : > { %5652 = vmatprep.subr.bf16.mxu1 %v7370_v41 }
 0x550   : > { %5654 = vmatpush3.bf16.msra.mxu1 %v7370_v41 }
 0x551   : > { %5656 = vmatprep.subr.bf16.mxu1 %v7374_v21 }
 0x554   : > { %5658 = vmatpush3.bf16.msra.mxu1 %v7374_v21 }
 0x555   : > { %5660 = vmatprep.subr.bf16.mxu1 %v7378_v37 }
 0x558   : > { %5662 = vmatpush3.bf16.msra.mxu1 %v7378_v37 }
 0x559   : > { %5664 = vmatprep.subr.bf16.mxu1 %v7382_v2 }
 0x55c   : > { %5666 = vmatpush3.bf16.msra.mxu1 %v7382_v2 }
 0x55d   : > { %5668 = vmatprep.subr.bf16.mxu1 %v7121_v60 }
 0x55f   : > { %4876 = vmatmul.mubr.f32.vlgmr.msra.gmra.mrb[4].mxu1 %v7404_v12 }
 0x560   : > { %4878 = vmatprep.mubr.f32.mxu1 %v7431_v56  ;;  %5670 = vmatpush3.bf16.msra.mxu1 %v7121_v60  ;;  %v5711_v56 = vpack.c.bf16 %v7674_v50, %v7673_v13 }
 0x561   : > { %5672 = vmatprep.subr.bf16.mxu1 %v7127_v26 }
 0x563   : > { %4879 = vmatmul.mubr.f32.gmra.mrb[6].mxu1 %v7425_v27  ;;  %v7678_v27 = vand.u32 4294901760, %v7312_v9 }
 0x564   : > { %5674 = vmatpush3.bf16.msra.mxu1 %v7127_v26  ;;  %4913 = vmatprep.mubr.f32.mxu1 %v2796_v32 }
 0x565   : > { %5676 = vmatprep.subr.bf16.mxu1 %v7227_v11 }
 0x568   : > { %5678 = vmatpush3.bf16.msra.mxu1 %v7227_v11 }
 0x569   : > { %5680 = vmatprep.subr.bf16.mxu1 %v7231_v38 }
 0x56c   : > { %5682 = vmatpush3.bf16.msra.mxu1 %v7231_v38 }
 0x56d   : > { %5684 = vmatprep.subr.bf16.mxu1 %v7235_v1 }
 0x570   : > { %5686 = vmatpush3.bf16.msra.mxu1 %v7235_v1 }
 0x571   : > { %5688 = vmatprep.subr.bf16.mxu1 %v7239_v24 }
 0x574   : > { %5690 = vmatpush3.bf16.msra.mxu1 %v7239_v24 }
 0x575   : > { %5692 = vmatprep.subr.bf16.mxu1 %v7243_v52 }
 0x578   : > { %5694 = vmatpush3.bf16.msra.mxu1 %v7243_v52 }
 0x579   : > { %5696 = vmatprep.subr.bf16.mxu1 %v7259_v48 }
 0x57c   : > { %5698 = vmatpush3.bf16.msra.mxu1 %v7259_v48 }
 0x57d   : > { %5700 = vmatprep.subr.bf16.mxu1 %v5699_v30 }
 0x57f   : > { %4914 = vmatmul.mubr.f32.vlgmr.msra.gmra.mrb[4].mxu1 %v2806_v43 }
 0x580   : > { %4916 = vmatprep.mubr.f32.mxu1 %v2816_v47  ;;  %5702 = vmatpush3.bf16.msra.mxu1 %v5699_v30  ;;  %v7675_v47 = vand.u32 4294901760, %v7295_v49  ;;  %v7681_v49 = vand.u32 4294901760, %v7337_v17 }
 0x581   : > { %5704 = vmatprep.subr.bf16.mxu1 %v5703_v15 }
 0x582   : > { %v5715_v51 = vpack.c.bf16 %v7676_v28, %v7675_v47  ;;  %v5727_v57 = vpack.c.bf16 %v7682_v3, %v7681_v49 }
 0x583   : > { %4917 = vmatmul.mubr.f32.gmra.mrb[6].mxu1 %v2826_v62  ;;  %v7677_v62 = vand.u32 4294901760, %v7310_v44 }
 0x584   : > { %5706 = vmatpush3.bf16.msra.mxu1 %v5703_v15  ;;  %4951 = vmatprep.mubr.f32.mxu1 %v7401_v59 }
 0x585   : > { %5708 = vmatprep.subr.bf16.mxu1 %v5707_v29  ;;  %v5719_v63 = vpack.c.bf16 %v7678_v27, %v7677_v62 }
 0x588   : > { %5710 = vmatpush3.bf16.msra.mxu1 %v5707_v29 }
 0x589   : > { %5712 = vmatprep.subr.bf16.mxu1 %v5711_v56 }
 0x58c   : > { %5714 = vmatpush3.bf16.msra.mxu1 %v5711_v56 }
 0x58d   : > { %5716 = vmatprep.subr.bf16.mxu1 %v5715_v51 }
 0x590   : > { %5718 = vmatpush3.bf16.msra.mxu1 %v5715_v51 }
 0x591   : > { %5720 = vmatprep.subr.bf16.mxu1 %v5719_v63 }
 0x594   : > { %5722 = vmatpush3.bf16.msra.mxu1 %v5719_v63 }
 0x595   : > { %5724 = vmatprep.subr.bf16.mxu1 %v5723_v6 }
 0x598   : > { %5726 = vmatpush3.bf16.msra.mxu1 %v5723_v6 }
 0x599   : > { %5728 = vmatprep.subr.bf16.mxu1 %v5727_v57 }
 0x59c   : > { %5730 = vmatpush3.bf16.msra.mxu1 %v5727_v57 }
 0x59d   : > { %5732 = vmatprep.subr.bf16.mxu1 %v7121_v60 }
 0x59f   : > { %4952 = vmatmul.mubr.f32.vlgmr.msra.gmra.mrb[4].mxu1 %v7399_v20 }
 0x5a0   : > { %4954 = vmatprep.mubr.f32.mxu1 %v7418_v4  ;;  %5734 = vmatpush3.bf16.msra.mxu1 %v7121_v60  ;;  %v3599_v60 = vld [vmem:[%s7575_s6] ss:$0 sm:$0xff] }
 0x5a1   : > { %5736 = vmatprep.subr.bf16.mxu1 %v7127_v26 }
 0x5a3   : > { %4955 = vmatmul.mubr.f32.gmra.mrb[6].mxu1 %v7415_v19 }
 0x5a4   : > { %5738 = vmatpush3.bf16.msra.mxu1 %v7127_v26  ;;  %4989 = vmatprep.mubr.f32.mxu1 %v7401_v59 }
 0x5a5   : > { %5740 = vmatprep.subr.bf16.mxu1 %v7227_v11 }
 0x5a8   : > { %5742 = vmatpush3.bf16.msra.mxu1 %v7227_v11  ;;  %v3485_v11 = vstv %s3600_s17 }
 0x5a9   : > { %5744 = vmatprep.subr.bf16.mxu1 %v7231_v38 }
 0x5ac   : > { %5746 = vmatpush3.bf16.msra.mxu1 %v7231_v38 }
 0x5ad   : > { %5748 = vmatprep.subr.bf16.mxu1 %v7235_v1 }
 0x5b0   : > { %5750 = vmatpush3.bf16.msra.mxu1 %v7235_v1 }
 0x5b1   : > { %5752 = vmatprep.subr.bf16.mxu1 %v7239_v24 }
 0x5b4   : > { %5754 = vmatpush3.bf16.msra.mxu1 %v7239_v24 }
 0x5b5   : > { %5756 = vmatprep.subr.bf16.mxu1 %v7243_v52 }
 0x5b8   : > { %5758 = vmatpush3.bf16.msra.mxu1 %v7243_v52 }
 0x5b9   : > { %5760 = vmatprep.subr.bf16.mxu1 %v7259_v48 }
 0x5bc   : > { %5762 = vmatpush3.bf16.msra.mxu1 %v7259_v48 }
 0x5bf   : > { %4990 = vmatmul.mubr.f32.vlgmr.msra.gmra.mrb[4].mxu1 %v7399_v20 }
 0x5c0   : > { %4992 = vmatprep.mubr.f32.mxu1 %v7418_v4 }
 0x5c3   : > { %4993 = vmatmul.mubr.f32.gmra.mrb[6].mxu1 %v7415_v19 }
 0x692   : > { %v4991_v26 = vpop.f32.mrb[4].mxu1 }
 0x693   : > { %v5775_v38 = vadd.f32 %v4991_v26, %v3599_v60  ;;  %v3461_v1 = vpop.f32.mrb[5].mxu1 }
 0x694   : > { %v5776_v24 = vadd.f32 %v3599_v60, %v3461_v1 }
 0x695   : > { %v3487_v52 = vmul.f32 %v5775_v38, %v3485_v11 }
 0x696   : > { %v3486_v44 = vmul.f32 %v5776_v24, %v3485_v11  ;;  %v4994_v48 = vpop.f32.mrb[6].mxu1 }
 0x697   : > { %5915 = vtanh.f32 %v3487_v52  ;;  %v5777_v9 = vadd.f32 %v4994_v48, %v3599_v60  ;;  %v3473_v40 = vpop.f32.mrb[7].mxu1 }
 0x698   : > { %5917 = vtanh.f32 %v3486_v44  ;;  %v5778_v34 = vadd.f32 %v3599_v60, %v3473_v40 }
 0x699   : > { %v3489_v54 = vmul.f32 %v5777_v9, %v3485_v11 }
 0x69a   : > { %v3488_v4 = vmul.f32 %v5778_v34, %v3485_v11 }
 0x69b   : > { %5919 = vtanh.f32 %v3489_v54 }
 0x69c   : > { %5921 = vtanh.f32 %v3488_v4 }
 0x6a1   : > { %v5916_v17 = vpop.eup %5915 }
 0x6a2   : > { %v5918_v36 = vpop.eup %5917  ;;  %v3496_v14 = vmul.f32 %v5916_v17, %v3494_v53 }
 0x6a3   : > { %v3495_v43 = vmul.f32 %v5918_v36, %v3494_v53 }
 0x6a4   : > { %3500 = vst [vmem:[%s290_s10 + $0x8] sm:$0xff] %v3496_v14 }
 0x6a5   : > { %v5920_v23 = vpop.eup %5919  ;;  %3499 = vst [vmem:[%s290_s10] sm:$0xff] %v3495_v43 }
 0x6a6   : > { %v5922_v18 = vpop.eup %5921  ;;  %v3498_v31 = vmul.f32 %v5920_v23, %v3494_v53 }
 0x6a7   : > { %v3497_v42 = vmul.f32 %v5922_v18, %v3494_v53 }
 0x6a8   : > { %3502 = vst [vmem:[%s290_s10 + $0x18] sm:$0xff] %v3498_v31 }
 0x6a9   : > { %3501 = vst [vmem:[%s290_s10 + $0x10] sm:$0xff] %v3497_v42 }
 0x6aa PF: > { %s25_s29 = sadd.s32 1, %s6007_s29  }
 0x6ab   : > { %p22_p10 = scmp.ge.s32.totalorder %s25_s29, 4  }
 0x6ad   :  { %24 = sbr.rel (!%p22_p10) target bundleno = 17 (0x11), region = 86 }
 0x6b4   :  { %3525 = vsyncpa [#allocation5], 1 }
 0x6b5   :  { %3527 = vsyncpa [#allocation5 + $0x1], 1 }
 0x6b6   :  { %3528 = vsyncpa [#allocation7], 1 }

</bundles_post_ra>
